<compile_context>
chip_gen: v7x
topology: tpu7x:2x2x1
jax: 0.10.0
libtpu: 0.0.40
codegen_flags: <defaults>
</compile_context>

<pallas_src>
import jax
import jax.numpy as jnp
from jax.experimental import pallas as pl
from jax.experimental.pallas import tpu as pltpu

# ---- model hyper-parameters (small, deterministic demo) ---------------------
B = 2          # batch
S = 8          # sequence length
D_MODEL = 32   # model dim ("layer.size")
N_HEADS = 4    # attention heads
D_FF = 64      # feed-forward hidden dim
N_LAYERS = 2   # encoder depth
EPS = 1e-6     # LayerNorm eps (matches the PyTorch module)
DK = D_MODEL // N_HEADS

BLOCK_B = 1                 # batch elements per grid step
ROWS = BLOCK_B * S          # activation rows per block
BH = BLOCK_B * N_HEADS      # batched-head leading dim inside the kernel

# ---- packed small-vector layout (one 128-lane row per vector) ---------------
VEC_PAD = 128
(R_BQKV, R_BO, R_B1, R_B2, R_LN1A, R_LN1B, R_LN2A, R_LN2B) = range(8)
VEC_ROWS_PER_LAYER = 8
R_FINAL_A = N_LAYERS * VEC_ROWS_PER_LAYER
R_FINAL_B = R_FINAL_A + 1
N_VEC_ROWS = R_FINAL_B + 1


# ---- in-kernel helpers -------------------------------------------------------
def _kernel_layernorm(x, a, b):
    """torch-semantics LayerNorm (unbiased std, eps added to the std).

    Variance via independent sum(x) / sum(x*x) (two back-to-back XLU reduces
    instead of a serial mean->center->square->sum chain); divide replaced by
    an EUP approximate reciprocal (VALU-free).
    """
    d = x.shape[-1]
    sx = jnp.sum(x, axis=-1, keepdims=True)
    sxx = jnp.sum(x * x, axis=-1, keepdims=True)
    mean = sx * (1.0 / d)
    var = (sxx - d * mean * mean) * (1.0 / (d - 1))
    std = jnp.sqrt(jnp.maximum(var, 0.0))        # guard tiny negative from cancellation
    return a * (x - mean) * pl.reciprocal(std + EPS, approx=True) + b


# ---- fused encoder kernel (all layers + final norm per row block) -----------
def encoder_kernel(x_ref, wqkv_ref, wo_ref, w1_ref, w2_ref, vec_ref, o_ref):
    x = x_ref[...]                                    # (ROWS, D) float32
    scale = 1.0 / (DK ** 0.5)

    def vec(row, width):                              # (1, width) static slice
        return vec_ref[row:row + 1, 0:width]

    for l in range(N_LAYERS):                         # static unroll (N=2)
        base = l * VEC_ROWS_PER_LAYER
        bqkv = vec(base + R_BQKV, 3 * D_MODEL)
        bo = vec(base + R_BO, D_MODEL)
        b1 = vec(base + R_B1, D_FF)
        b2 = vec(base + R_B2, D_MODEL)
        ln1a = vec(base + R_LN1A, D_MODEL)
        ln1b = vec(base + R_LN1B, D_MODEL)
        ln2a = vec(base + R_LN2A, D_MODEL)
        ln2b = vec(base + R_LN2B, D_MODEL)

        # --- sublayer 1: x + SelfAttn(LayerNorm(x)) --------------------------
        xn = _kernel_layernorm(x, ln1a, ln1b)
        # TODO(synk): at production sizes cast matmul operands to bf16 (f32
        # accumulate) and make D_MODEL/D_FF multiples of 256 (v6e/v7x MXU);
        # kept f32 here so the small-shape parity check stays tight.
        qkv = jnp.dot(xn, wqkv_ref[l], preferred_element_type=jnp.float32) + bqkv

        # Heads moved to a leading batch axis so softmax + both attention
        # matmuls are single batched ops over all heads (no per-head unroll).
        # TODO(synk): at production sizes make DK a multiple of 128 so these
        # per-head lane slices become tile-aligned (no lane-shuffle cost).
        def split_heads(off):   # -> (BH, S, DK), head-major along the batch axis
            return jnp.concatenate(
                [qkv[:, off + h * DK: off + (h + 1) * DK].reshape(BLOCK_B, S, DK)
                 for h in range(N_HEADS)], axis=0)

        q = split_heads(0)
        k = split_heads(D_MODEL)
        v = split_heads(2 * D_MODEL)

        s = jnp.einsum("bqd,bkd->bqk", q, k,
                       preferred_element_type=jnp.float32) * scale   # (BH,S,S)
        m = jnp.max(s, axis=-1, keepdims=True)
        p = jnp.exp(s - m)
        p = p * pl.reciprocal(jnp.sum(p, axis=-1, keepdims=True), approx=True)
        ctx = jnp.einsum("bqk,bkd->bqd", p, v,
                         preferred_element_type=jnp.float32)          # (BH,S,DK)

        # Re-pack heads along the lane axis (XLU/VALU selects, not MXU) and do
        # ONE (ROWS,D)@(D,D) output projection instead of 4 K=8 dots.
        ctx2d = jnp.concatenate(
            [ctx[h * BLOCK_B:(h + 1) * BLOCK_B].reshape(ROWS, DK)
             for h in range(N_HEADS)], axis=-1)                       # (ROWS, D)
        attn = jnp.dot(ctx2d, wo_ref[l], preferred_element_type=jnp.float32)
        # TODO(synk): dropout inside SublayerConnection omitted (eval / p=0).
        x = x + attn + bo

        # --- sublayer 2: x + FFN(LayerNorm(x)) -------------------------------
        xn2 = _kernel_layernorm(x, ln2a, ln2b)
        h1 = jnp.dot(xn2, w1_ref[l], preferred_element_type=jnp.float32) + b1
        h1 = jnp.maximum(h1, 0.0)                     # ReLU
        x = x + jnp.dot(h1, w2_ref[l], preferred_element_type=jnp.float32) + b2

    # --- final Encoder-level LayerNorm ---------------------------------------
    fa = vec(R_FINAL_A, D_MODEL)
    fb = vec(R_FINAL_B, D_MODEL)
    o_ref[...] = _kernel_layernorm(x, fa, fb).astype(o_ref.dtype)


# ---- host-side packing + pallas_call wrapper ---------------------------------
def pack_params(layer_params, final_a, final_b):
    wqkv, wo, w1, w2, vec_rows = [], [], [], [], []
    for (wq, bq, wk, bk, wv, bv, wo_l, bo, w1_l, b1, w2_l, b2,
         ln1a, ln1b, ln2a, ln2b) in layer_params:
        wqkv.append(jnp.concatenate([wq, wk, wv], axis=1))   # (D, 3D)
        wo.append(wo_l)
        w1.append(w1_l)
        w2.append(w2_l)
        vec_rows += [jnp.concatenate([bq, bk, bv]), bo, b1, b2,
                     ln1a, ln1b, ln2a, ln2b]
    vec_rows += [final_a, final_b]
    assert len(vec_rows) == N_VEC_ROWS
    vec = jnp.zeros((N_VEC_ROWS, VEC_PAD), jnp.float32)
    for i, r in enumerate(vec_rows):
        assert r.shape[0] <= VEC_PAD
        vec = vec.at[i, :r.shape[0]].set(r)
    return (jnp.stack(wqkv), jnp.stack(wo), jnp.stack(w1), jnp.stack(w2), vec)


@jax.jit
def encoder_forward(x, wqkv, wo, w1, w2, vec):
    x2 = x.reshape(B * S, D_MODEL)
    # Row grid over batch elements (each block = one full sequence, since
    # attention mixes within a sequence); weights use constant-index specs so
    # they stay VMEM-resident across grid steps. The row axis is "parallel"
    # (megacore sharding on v7x, activation DMA pipelined against compute).
    # TODO(synk): at production sizes add an "arbitrary" layer grid axis (with
    # bf16 weights / pl.Buffered streaming) so only ~1 layer of weights is
    # VMEM-resident — required to fit v7x's 64 MiB VMEM.
    out = pl.pallas_call(
        encoder_kernel,
        out_shape=jax.ShapeDtypeStruct((B * S, D_MODEL), jnp.float32),
        grid_spec=pltpu.PrefetchScalarGridSpec(
            num_scalar_prefetch=0,
            grid=(B // BLOCK_B,),
            in_specs=[
                pl.BlockSpec((ROWS, D_MODEL), lambda i: (i, 0)),
                pl.BlockSpec((N_LAYERS, D_MODEL, 3 * D_MODEL), lambda i: (0, 0, 0)),
                pl.BlockSpec((N_LAYERS, D_MODEL, D_MODEL), lambda i: (0, 0, 0)),
                pl.BlockSpec((N_LAYERS, D_MODEL, D_FF), lambda i: (0, 0, 0)),
                pl.BlockSpec((N_LAYERS, D_FF, D_MODEL), lambda i: (0, 0, 0)),
                pl.BlockSpec((N_VEC_ROWS, VEC_PAD), lambda i: (0, 0)),
            ],
            out_specs=pl.BlockSpec((ROWS, D_MODEL), lambda i: (i, 0)),
        ),
        compiler_params=pltpu.CompilerParams(
            dimension_semantics=("parallel",)),
    )(x2, wqkv, wo, w1, w2, vec)
    return out.reshape(B, S, D_MODEL)


# ---- pure-JAX reference (exact math) for correctness --------------------------
def _ref_layernorm(x, a, b):
    d = x.shape[-1]
    mean = jnp.mean(x, axis=-1, keepdims=True)
    var = jnp.sum((x - mean) ** 2, axis=-1, keepdims=True) / (d - 1)
    return a * (x - mean) / (jnp.sqrt(var) + EPS) + b


def _ref_layer(x, p):
    (wq, bq, wk, bk, wv, bv, wo, bo, w1, b1, w2, b2,
     ln1a, ln1b, ln2a, ln2b) = p
    xn = _ref_layernorm(x, ln1a, ln1b)
    q, k, v = xn @ wq + bq, xn @ wk + bk, xn @ wv + bv

    def split(t):  # (B,S,D) -> (B,H,S,dk)
        return t.reshape(B, S, N_HEADS, DK).transpose(0, 2, 1, 3)

    qh, kh, vh = split(q), split(k), split(v)
    scores = jnp.einsum("bhqd,bhkd->bhqk", qh, kh) / jnp.sqrt(jnp.float32(DK))
    p_attn = jax.nn.softmax(scores, axis=-1)
    attn = jnp.einsum("bhqk,bhkd->bhqd", p_attn, vh)
    attn = attn.transpose(0, 2, 1, 3).reshape(B, S, D_MODEL) @ wo + bo
    x1 = x + attn
    xn2 = _ref_layernorm(x1, ln2a, ln2b)
    ff = jnp.maximum(xn2 @ w1 + b1, 0.0) @ w2 + b2
    return x1 + ff


def _ref_encoder(x, layer_params, fa, fb):
    for p in layer_params:
        x = _ref_layer(x, p)
    return _ref_layernorm(x, fa, fb)


# ---- deterministic parameter construction ------------------------------------
def make_params(key):
    layer_params = []
    for _ in range(N_LAYERS):
        keys = jax.random.split(key, 17)
        key = keys[0]

        def n(k, shape, s=0.1):
            return s * jax.random.normal(k, shape, jnp.float32)

        wq = n(keys[1], (D_MODEL, D_MODEL))
        wk = n(keys[2], (D_MODEL, D_MODEL))
        wv = n(keys[3], (D_MODEL, D_MODEL))
        wo = n(keys[4], (D_MODEL, D_MODEL))
        w1 = n(keys[5], (D_MODEL, D_FF))
        w2 = n(keys[6], (D_FF, D_MODEL))
        bq = n(keys[7], (D_MODEL,), 0.05)
        bk = n(keys[8], (D_MODEL,), 0.05)
        bv = n(keys[9], (D_MODEL,), 0.05)
        bo = n(keys[10], (D_MODEL,), 0.05)
        b1 = n(keys[11], (D_FF,), 0.05)
        b2 = n(keys[12], (D_MODEL,), 0.05)
        ln1a = 1.0 + n(keys[13], (D_MODEL,), 0.05)
        ln1b = n(keys[14], (D_MODEL,), 0.05)
        ln2a = 1.0 + n(keys[15], (D_MODEL,), 0.05)
        ln2b = n(keys[16], (D_MODEL,), 0.05)
        layer_params.append((wq, bq, wk, bk, wv, bv, wo, bo,
                             w1, b1, w2, b2, ln1a, ln1b, ln2a, ln2b))
    keys = jax.random.split(key, 3)
    key = keys[0]
    final_a = 1.0 + 0.05 * jax.random.normal(keys[1], (D_MODEL,), jnp.float32)
    final_b = 0.05 * jax.random.normal(keys[2], (D_MODEL,), jnp.float32)
    return layer_params, final_a, final_b, key


if __name__ == "__main__":
    key = jax.random.PRNGKey(0)
    layer_params, final_a, final_b, key = make_params(key)
    x = jax.random.normal(key, (B, S, D_MODEL), jnp.float32)

    wqkv, wo, w1, w2, vec = pack_params(layer_params, final_a, final_b)
    out = encoder_forward(x, wqkv, wo, w1, w2, vec)
    out = jax.block_until_ready(out)

    ref = _ref_encoder(x, layer_params, final_a, final_b)
    assert out.shape == (B, S, D_MODEL)
    # 3e-3 tolerance: softmax AND LayerNorm divides use the EUP approximate
    # reciprocal (~2^-12 rel. error) and LayerNorm variance uses the
    # sum(x^2)-n*mean^2 form; all other math is exact f32.
    assert jnp.allclose(out, ref, atol=3e-3, rtol=3e-3), "mismatch vs reference"

    print("KERNEL_OK")
</pallas_src>

<mosaic_0001>
module attributes {stable_mosaic.version = 11 : i64} {
  func.func @encoder_kernel(%arg0: i32, %arg1: memref<8x32xf32, #tpu.memory_space<vmem>>, %arg2: memref<2x32x96xf32, #tpu.memory_space<vmem>>, %arg3: memref<2x32x32xf32, #tpu.memory_space<vmem>>, %arg4: memref<2x32x64xf32, #tpu.memory_space<vmem>>, %arg5: memref<2x64x32xf32, #tpu.memory_space<vmem>>, %arg6: memref<18x128xf32, #tpu.memory_space<vmem>>, %arg7: memref<8x32xf32, #tpu.memory_space<vmem>>) attributes {dimension_semantics = [#tpu.dimension_semantics<parallel>], iteration_bounds = array<i64: 2>, scalar_prefetch = 0 : i64, scratch_operands = 0 : i64, tpu.core_type = #tpu.core_type<tc>, window_params = [{transform_indices = @transform_0, window_bounds = array<i64: 8, 32>}, {pipeline_mode = #tpu.pipeline_mode<synchronous>, transform_indices = @transform_1, window_bounds = array<i64: 2, 32, 96>}, {pipeline_mode = #tpu.pipeline_mode<synchronous>, transform_indices = @transform_2, window_bounds = array<i64: 2, 32, 32>}, {pipeline_mode = #tpu.pipeline_mode<synchronous>, transform_indices = @transform_3, window_bounds = array<i64: 2, 32, 64>}, {pipeline_mode = #tpu.pipeline_mode<synchronous>, transform_indices = @transform_4, window_bounds = array<i64: 2, 64, 32>}, {pipeline_mode = #tpu.pipeline_mode<synchronous>, transform_indices = @transform_5, window_bounds = array<i64: 18, 128>}, {transform_indices = @transform_6, window_bounds = array<i64: 8, 32>}]} {
    %c0 = arith.constant 0 : index
    %c0_0 = arith.constant 0 : index
    %0 = vector.load %arg1[%c0, %c0_0] : memref<8x32xf32, #tpu.memory_space<vmem>>, vector<8x32xf32>
    %c0_1 = arith.constant 0 : index
    %c0_2 = arith.constant 0 : index
    %1 = vector.load %arg6[%c0_1, %c0_2] : memref<18x128xf32, #tpu.memory_space<vmem>>, vector<1x96xf32>
    %c1 = arith.constant 1 : index
    %c0_3 = arith.constant 0 : index
    %2 = vector.load %arg6[%c1, %c0_3] : memref<18x128xf32, #tpu.memory_space<vmem>>, vector<1x32xf32>
    %c2 = arith.constant 2 : index
    %c0_4 = arith.constant 0 : index
    %3 = vector.load %arg6[%c2, %c0_4] : memref<18x128xf32, #tpu.memory_space<vmem>>, vector<1x64xf32>
    %c3 = arith.constant 3 : index
    %c0_5 = arith.constant 0 : index
    %4 = vector.load %arg6[%c3, %c0_5] : memref<18x128xf32, #tpu.memory_space<vmem>>, vector<1x32xf32>
    %c4 = arith.constant 4 : index
    %c0_6 = arith.constant 0 : index
    %5 = vector.load %arg6[%c4, %c0_6] : memref<18x128xf32, #tpu.memory_space<vmem>>, vector<1x32xf32>
    %c5 = arith.constant 5 : index
    %c0_7 = arith.constant 0 : index
    %6 = vector.load %arg6[%c5, %c0_7] : memref<18x128xf32, #tpu.memory_space<vmem>>, vector<1x32xf32>
    %c6 = arith.constant 6 : index
    %c0_8 = arith.constant 0 : index
    %7 = vector.load %arg6[%c6, %c0_8] : memref<18x128xf32, #tpu.memory_space<vmem>>, vector<1x32xf32>
    %c7 = arith.constant 7 : index
    %c0_9 = arith.constant 0 : index
    %8 = vector.load %arg6[%c7, %c0_9] : memref<18x128xf32, #tpu.memory_space<vmem>>, vector<1x32xf32>
    %cst = arith.constant dense<0.000000e+00> : vector<8xf32>
    %9 = vector.multi_reduction <add>, %0, %cst [1] : vector<8x32xf32> to vector<8xf32>
    %10 = vector.shape_cast %9 : vector<8xf32> to vector<8x1xf32>
    %11 = arith.mulf %0, %0 : vector<8x32xf32>
    %cst_10 = arith.constant dense<0.000000e+00> : vector<8xf32>
    %12 = vector.multi_reduction <add>, %11, %cst_10 [1] : vector<8x32xf32> to vector<8xf32>
    %13 = vector.shape_cast %12 : vector<8xf32> to vector<8x1xf32>
    %cst_11 = arith.constant 3.125000e-02 : f32
    %14 = vector.broadcast %cst_11 : f32 to vector<8x1xf32>
    %15 = arith.mulf %10, %14 : vector<8x1xf32>
    %cst_12 = arith.constant 3.200000e+01 : f32
    %16 = vector.broadcast %cst_12 : f32 to vector<8x1xf32>
    %17 = arith.mulf %16, %15 : vector<8x1xf32>
    %18 = arith.mulf %17, %15 : vector<8x1xf32>
    %19 = arith.subf %13, %18 : vector<8x1xf32>
    %cst_13 = arith.constant 0.0322580636 : f32
    %20 = vector.broadcast %cst_13 : f32 to vector<8x1xf32>
    %21 = arith.mulf %19, %20 : vector<8x1xf32>
    %cst_14 = arith.constant 0.000000e+00 : f32
    %22 = vector.broadcast %cst_14 : f32 to vector<8x1xf32>
    %23 = arith.maximumf %21, %22 : vector<8x1xf32>
    %24 = math.sqrt %23 : vector<8x1xf32>
    %25 = vector.broadcast %15 : vector<8x1xf32> to vector<8x32xf32>
    %26 = arith.subf %0, %25 : vector<8x32xf32>
    %27 = vector.broadcast %5 : vector<1x32xf32> to vector<8x32xf32>
    %28 = arith.mulf %27, %26 : vector<8x32xf32>
    %cst_15 = arith.constant 9.99999997E-7 : f32
    %29 = vector.broadcast %cst_15 : f32 to vector<8x1xf32>
    %30 = arith.addf %24, %29 : vector<8x1xf32>
    %31 = tpu.reciprocal %30 {approx = true} : vector<8x1xf32> -> vector<8x1xf32>
    %32 = vector.broadcast %31 : vector<8x1xf32> to vector<8x32xf32>
    %33 = arith.mulf %28, %32 : vector<8x32xf32>
    %34 = vector.broadcast %6 : vector<1x32xf32> to vector<8x32xf32>
    %35 = arith.addf %33, %34 : vector<8x32xf32>
    %c0_16 = arith.constant 0 : index
    %c0_17 = arith.constant 0 : index
    %c0_18 = arith.constant 0 : index
    %36 = vector.load %arg2[%c0_16, %c0_17, %c0_18] : memref<2x32x96xf32, #tpu.memory_space<vmem>>, vector<1x32x96xf32>
    %37 = vector.shape_cast %36 : vector<1x32x96xf32> to vector<32x96xf32>
    %cst_19 = arith.constant dense<0.000000e+00> : vector<8x96xf32>
    %38 = tpu.matmul %35, %37, %cst_19 {dimension_numbers = #tpu.dot_dimension_numbers<[1], [0], [0], [1], [0, 0, 1, 1], [], []>} : vector<8x32xf32>, vector<32x96xf32>, vector<8x96xf32> -> vector<8x96xf32>
    %39 = vector.broadcast %1 : vector<1x96xf32> to vector<8x96xf32>
    %40 = arith.addf %38, %39 : vector<8x96xf32>
    %41 = vector.extract_strided_slice %40 {offsets = [0, 0], sizes = [8, 8], strides = [1, 1]} : vector<8x96xf32> to vector<8x8xf32>
    %42 = vector.shape_cast %41 : vector<8x8xf32> to vector<1x8x8xf32>
    %43 = vector.extract_strided_slice %40 {offsets = [0, 8], sizes = [8, 8], strides = [1, 1]} : vector<8x96xf32> to vector<8x8xf32>
    %44 = vector.shape_cast %43 : vector<8x8xf32> to vector<1x8x8xf32>
    %45 = vector.extract_strided_slice %40 {offsets = [0, 16], sizes = [8, 8], strides = [1, 1]} : vector<8x96xf32> to vector<8x8xf32>
    %46 = vector.shape_cast %45 : vector<8x8xf32> to vector<1x8x8xf32>
    %47 = vector.extract_strided_slice %40 {offsets = [0, 24], sizes = [8, 8], strides = [1, 1]} : vector<8x96xf32> to vector<8x8xf32>
    %48 = vector.shape_cast %47 : vector<8x8xf32> to vector<1x8x8xf32>
    %49 = tpu.concatenate %42, %44, %46, %48 in 0 : vector<1x8x8xf32>, vector<1x8x8xf32>, vector<1x8x8xf32>, vector<1x8x8xf32> -> vector<4x8x8xf32>
    %50 = vector.extract_strided_slice %40 {offsets = [0, 32], sizes = [8, 8], strides = [1, 1]} : vector<8x96xf32> to vector<8x8xf32>
    %51 = vector.shape_cast %50 : vector<8x8xf32> to vector<1x8x8xf32>
    %52 = vector.extract_strided_slice %40 {offsets = [0, 40], sizes = [8, 8], strides = [1, 1]} : vector<8x96xf32> to vector<8x8xf32>
    %53 = vector.shape_cast %52 : vector<8x8xf32> to vector<1x8x8xf32>
    %54 = vector.extract_strided_slice %40 {offsets = [0, 48], sizes = [8, 8], strides = [1, 1]} : vector<8x96xf32> to vector<8x8xf32>
    %55 = vector.shape_cast %54 : vector<8x8xf32> to vector<1x8x8xf32>
    %56 = vector.extract_strided_slice %40 {offsets = [0, 56], sizes = [8, 8], strides = [1, 1]} : vector<8x96xf32> to vector<8x8xf32>
    %57 = vector.shape_cast %56 : vector<8x8xf32> to vector<1x8x8xf32>
    %58 = tpu.concatenate %51, %53, %55, %57 in 0 : vector<1x8x8xf32>, vector<1x8x8xf32>, vector<1x8x8xf32>, vector<1x8x8xf32> -> vector<4x8x8xf32>
    %59 = vector.extract_strided_slice %40 {offsets = [0, 64], sizes = [8, 8], strides = [1, 1]} : vector<8x96xf32> to vector<8x8xf32>
    %60 = vector.shape_cast %59 : vector<8x8xf32> to vector<1x8x8xf32>
    %61 = vector.extract_strided_slice %40 {offsets = [0, 72], sizes = [8, 8], strides = [1, 1]} : vector<8x96xf32> to vector<8x8xf32>
    %62 = vector.shape_cast %61 : vector<8x8xf32> to vector<1x8x8xf32>
    %63 = vector.extract_strided_slice %40 {offsets = [0, 80], sizes = [8, 8], strides = [1, 1]} : vector<8x96xf32> to vector<8x8xf32>
    %64 = vector.shape_cast %63 : vector<8x8xf32> to vector<1x8x8xf32>
    %65 = vector.extract_strided_slice %40 {offsets = [0, 88], sizes = [8, 8], strides = [1, 1]} : vector<8x96xf32> to vector<8x8xf32>
    %66 = vector.shape_cast %65 : vector<8x8xf32> to vector<1x8x8xf32>
    %67 = tpu.concatenate %60, %62, %64, %66 in 0 : vector<1x8x8xf32>, vector<1x8x8xf32>, vector<1x8x8xf32>, vector<1x8x8xf32> -> vector<4x8x8xf32>
    "tpu.trace_start"() <{level = 10 : i32, message = "bqd,bkd->bqk"}> : () -> ()
    %cst_20 = arith.constant dense<0.000000e+00> : vector<4x8x8xf32>
    %68 = tpu.matmul %49, %58, %cst_20 {dimension_numbers = #tpu.dot_dimension_numbers<[2], [2], [1], [1], [0, 0, 0, 1, 1, 1], [0], [0]>} : vector<4x8x8xf32>, vector<4x8x8xf32>, vector<4x8x8xf32> -> vector<4x8x8xf32>
    "tpu.trace_stop"() : () -> ()
    %cst_21 = arith.constant 0.353553385 : f32
    %69 = vector.broadcast %cst_21 : f32 to vector<4x8x8xf32>
    %70 = arith.mulf %68, %69 : vector<4x8x8xf32>
    %cst_22 = arith.constant dense<0xFF800000> : vector<4x8xf32>
    %71 = vector.multi_reduction <maximumf>, %70, %cst_22 [2] : vector<4x8x8xf32> to vector<4x8xf32>
    %72 = vector.shape_cast %71 : vector<4x8xf32> to vector<4x8x1xf32>
    %73 = vector.broadcast %72 : vector<4x8x1xf32> to vector<4x8x8xf32>
    %74 = arith.subf %70, %73 : vector<4x8x8xf32>
    %75 = math.exp %74 : vector<4x8x8xf32>
    %cst_23 = arith.constant dense<0.000000e+00> : vector<4x8xf32>
    %76 = vector.multi_reduction <add>, %75, %cst_23 [2] : vector<4x8x8xf32> to vector<4x8xf32>
    %77 = vector.shape_cast %76 : vector<4x8xf32> to vector<4x8x1xf32>
    %78 = tpu.reciprocal %77 {approx = true} : vector<4x8x1xf32> -> vector<4x8x1xf32>
    %79 = vector.broadcast %78 : vector<4x8x1xf32> to vector<4x8x8xf32>
    %80 = arith.mulf %75, %79 : vector<4x8x8xf32>
    "tpu.trace_start"() <{level = 10 : i32, message = "bqk,bkd->bqd"}> : () -> ()
    %cst_24 = arith.constant dense<0.000000e+00> : vector<4x8x8xf32>
    %81 = tpu.matmul %80, %67, %cst_24 {dimension_numbers = #tpu.dot_dimension_numbers<[2], [1], [1], [2], [0, 0, 0, 1, 1, 2], [0], [0]>} : vector<4x8x8xf32>, vector<4x8x8xf32>, vector<4x8x8xf32> -> vector<4x8x8xf32>
    "tpu.trace_stop"() : () -> ()
    %82 = vector.extract_strided_slice %81 {offsets = [0, 0, 0], sizes = [1, 8, 8], strides = [1, 1, 1]} : vector<4x8x8xf32> to vector<1x8x8xf32>
    %83 = vector.shape_cast %82 : vector<1x8x8xf32> to vector<8x8xf32>
    %84 = vector.extract_strided_slice %81 {offsets = [1, 0, 0], sizes = [1, 8, 8], strides = [1, 1, 1]} : vector<4x8x8xf32> to vector<1x8x8xf32>
    %85 = vector.shape_cast %84 : vector<1x8x8xf32> to vector<8x8xf32>
    %86 = vector.extract_strided_slice %81 {offsets = [2, 0, 0], sizes = [1, 8, 8], strides = [1, 1, 1]} : vector<4x8x8xf32> to vector<1x8x8xf32>
    %87 = vector.shape_cast %86 : vector<1x8x8xf32> to vector<8x8xf32>
    %88 = vector.extract_strided_slice %81 {offsets = [3, 0, 0], sizes = [1, 8, 8], strides = [1, 1, 1]} : vector<4x8x8xf32> to vector<1x8x8xf32>
    %89 = vector.shape_cast %88 : vector<1x8x8xf32> to vector<8x8xf32>
    %90 = tpu.concatenate %83, %85, %87, %89 in 1 : vector<8x8xf32>, vector<8x8xf32>, vector<8x8xf32>, vector<8x8xf32> -> vector<8x32xf32>
    %c0_25 = arith.constant 0 : index
    %c0_26 = arith.constant 0 : index
    %c0_27 = arith.constant 0 : index
    %91 = vector.load %arg3[%c0_25, %c0_26, %c0_27] : memref<2x32x32xf32, #tpu.memory_space<vmem>>, vector<1x32x32xf32>
    %92 = vector.shape_cast %91 : vector<1x32x32xf32> to vector<32x32xf32>
    %cst_28 = arith.constant dense<0.000000e+00> : vector<8x32xf32>
    %93 = tpu.matmul %90, %92, %cst_28 {dimension_numbers = #tpu.dot_dimension_numbers<[1], [0], [0], [1], [0, 0, 1, 1], [], []>} : vector<8x32xf32>, vector<32x32xf32>, vector<8x32xf32> -> vector<8x32xf32>
    %94 = arith.addf %0, %93 : vector<8x32xf32>
    %95 = vector.broadcast %2 : vector<1x32xf32> to vector<8x32xf32>
    %96 = arith.addf %94, %95 : vector<8x32xf32>
    %cst_29 = arith.constant dense<0.000000e+00> : vector<8xf32>
    %97 = vector.multi_reduction <add>, %96, %cst_29 [1] : vector<8x32xf32> to vector<8xf32>
    %98 = vector.shape_cast %97 : vector<8xf32> to vector<8x1xf32>
    %99 = arith.mulf %96, %96 : vector<8x32xf32>
    %cst_30 = arith.constant dense<0.000000e+00> : vector<8xf32>
    %100 = vector.multi_reduction <add>, %99, %cst_30 [1] : vector<8x32xf32> to vector<8xf32>
    %101 = vector.shape_cast %100 : vector<8xf32> to vector<8x1xf32>
    %cst_31 = arith.constant 3.125000e-02 : f32
    %102 = vector.broadcast %cst_31 : f32 to vector<8x1xf32>
    %103 = arith.mulf %98, %102 : vector<8x1xf32>
    %cst_32 = arith.constant 3.200000e+01 : f32
    %104 = vector.broadcast %cst_32 : f32 to vector<8x1xf32>
    %105 = arith.mulf %104, %103 : vector<8x1xf32>
    %106 = arith.mulf %105, %103 : vector<8x1xf32>
    %107 = arith.subf %101, %106 : vector<8x1xf32>
    %cst_33 = arith.constant 0.0322580636 : f32
    %108 = vector.broadcast %cst_33 : f32 to vector<8x1xf32>
    %109 = arith.mulf %107, %108 : vector<8x1xf32>
    %cst_34 = arith.constant 0.000000e+00 : f32
    %110 = vector.broadcast %cst_34 : f32 to vector<8x1xf32>
    %111 = arith.maximumf %109, %110 : vector<8x1xf32>
    %112 = math.sqrt %111 : vector<8x1xf32>
    %113 = vector.broadcast %103 : vector<8x1xf32> to vector<8x32xf32>
    %114 = arith.subf %96, %113 : vector<8x32xf32>
    %115 = vector.broadcast %7 : vector<1x32xf32> to vector<8x32xf32>
    %116 = arith.mulf %115, %114 : vector<8x32xf32>
    %cst_35 = arith.constant 9.99999997E-7 : f32
    %117 = vector.broadcast %cst_35 : f32 to vector<8x1xf32>
    %118 = arith.addf %112, %117 : vector<8x1xf32>
    %119 = tpu.reciprocal %118 {approx = true} : vector<8x1xf32> -> vector<8x1xf32>
    %120 = vector.broadcast %119 : vector<8x1xf32> to vector<8x32xf32>
    %121 = arith.mulf %116, %120 : vector<8x32xf32>
    %122 = vector.broadcast %8 : vector<1x32xf32> to vector<8x32xf32>
    %123 = arith.addf %121, %122 : vector<8x32xf32>
    %c0_36 = arith.constant 0 : index
    %c0_37 = arith.constant 0 : index
    %c0_38 = arith.constant 0 : index
    %124 = vector.load %arg4[%c0_36, %c0_37, %c0_38] : memref<2x32x64xf32, #tpu.memory_space<vmem>>, vector<1x32x64xf32>
    %125 = vector.shape_cast %124 : vector<1x32x64xf32> to vector<32x64xf32>
    %cst_39 = arith.constant dense<0.000000e+00> : vector<8x64xf32>
    %126 = tpu.matmul %123, %125, %cst_39 {dimension_numbers = #tpu.dot_dimension_numbers<[1], [0], [0], [1], [0, 0, 1, 1], [], []>} : vector<8x32xf32>, vector<32x64xf32>, vector<8x64xf32> -> vector<8x64xf32>
    %127 = vector.broadcast %3 : vector<1x64xf32> to vector<8x64xf32>
    %128 = arith.addf %126, %127 : vector<8x64xf32>
    %cst_40 = arith.constant 0.000000e+00 : f32
    %129 = vector.broadcast %cst_40 : f32 to vector<8x64xf32>
    %130 = arith.maximumf %128, %129 : vector<8x64xf32>
    %c0_41 = arith.constant 0 : index
    %c0_42 = arith.constant 0 : index
    %c0_43 = arith.constant 0 : index
    %131 = vector.load %arg5[%c0_41, %c0_42, %c0_43] : memref<2x64x32xf32, #tpu.memory_space<vmem>>, vector<1x64x32xf32>
    %132 = vector.shape_cast %131 : vector<1x64x32xf32> to vector<64x32xf32>
    %cst_44 = arith.constant dense<0.000000e+00> : vector<8x32xf32>
    %133 = tpu.matmul %130, %132, %cst_44 {dimension_numbers = #tpu.dot_dimension_numbers<[1], [0], [0], [1], [0, 0, 1, 1], [], []>} : vector<8x64xf32>, vector<64x32xf32>, vector<8x32xf32> -> vector<8x32xf32>
    %134 = arith.addf %96, %133 : vector<8x32xf32>
    %135 = vector.broadcast %4 : vector<1x32xf32> to vector<8x32xf32>
    %136 = arith.addf %134, %135 : vector<8x32xf32>
    %c8 = arith.constant 8 : index
    %c0_45 = arith.constant 0 : index
    %137 = vector.load %arg6[%c8, %c0_45] : memref<18x128xf32, #tpu.memory_space<vmem>>, vector<1x96xf32>
    %c9 = arith.constant 9 : index
    %c0_46 = arith.constant 0 : index
    %138 = vector.load %arg6[%c9, %c0_46] : memref<18x128xf32, #tpu.memory_space<vmem>>, vector<1x32xf32>
    %c10 = arith.constant 10 : index
    %c0_47 = arith.constant 0 : index
    %139 = vector.load %arg6[%c10, %c0_47] : memref<18x128xf32, #tpu.memory_space<vmem>>, vector<1x64xf32>
    %c11 = arith.constant 11 : index
    %c0_48 = arith.constant 0 : index
    %140 = vector.load %arg6[%c11, %c0_48] : memref<18x128xf32, #tpu.memory_space<vmem>>, vector<1x32xf32>
    %c12 = arith.constant 12 : index
    %c0_49 = arith.constant 0 : index
    %141 = vector.load %arg6[%c12, %c0_49] : memref<18x128xf32, #tpu.memory_space<vmem>>, vector<1x32xf32>
    %c13 = arith.constant 13 : index
    %c0_50 = arith.constant 0 : index
    %142 = vector.load %arg6[%c13, %c0_50] : memref<18x128xf32, #tpu.memory_space<vmem>>, vector<1x32xf32>
    %c14 = arith.constant 14 : index
    %c0_51 = arith.constant 0 : index
    %143 = vector.load %arg6[%c14, %c0_51] : memref<18x128xf32, #tpu.memory_space<vmem>>, vector<1x32xf32>
    %c15 = arith.constant 15 : index
    %c0_52 = arith.constant 0 : index
    %144 = vector.load %arg6[%c15, %c0_52] : memref<18x128xf32, #tpu.memory_space<vmem>>, vector<1x32xf32>
    %cst_53 = arith.constant dense<0.000000e+00> : vector<8xf32>
    %145 = vector.multi_reduction <add>, %136, %cst_53 [1] : vector<8x32xf32> to vector<8xf32>
    %146 = vector.shape_cast %145 : vector<8xf32> to vector<8x1xf32>
    %147 = arith.mulf %136, %136 : vector<8x32xf32>
    %cst_54 = arith.constant dense<0.000000e+00> : vector<8xf32>
    %148 = vector.multi_reduction <add>, %147, %cst_54 [1] : vector<8x32xf32> to vector<8xf32>
    %149 = vector.shape_cast %148 : vector<8xf32> to vector<8x1xf32>
    %cst_55 = arith.constant 3.125000e-02 : f32
    %150 = vector.broadcast %cst_55 : f32 to vector<8x1xf32>
    %151 = arith.mulf %146, %150 : vector<8x1xf32>
    %cst_56 = arith.constant 3.200000e+01 : f32
    %152 = vector.broadcast %cst_56 : f32 to vector<8x1xf32>
    %153 = arith.mulf %152, %151 : vector<8x1xf32>
    %154 = arith.mulf %153, %151 : vector<8x1xf32>
    %155 = arith.subf %149, %154 : vector<8x1xf32>
    %cst_57 = arith.constant 0.0322580636 : f32
    %156 = vector.broadcast %cst_57 : f32 to vector<8x1xf32>
    %157 = arith.mulf %155, %156 : vector<8x1xf32>
    %cst_58 = arith.constant 0.000000e+00 : f32
    %158 = vector.broadcast %cst_58 : f32 to vector<8x1xf32>
    %159 = arith.maximumf %157, %158 : vector<8x1xf32>
    %160 = math.sqrt %159 : vector<8x1xf32>
    %161 = vector.broadcast %151 : vector<8x1xf32> to vector<8x32xf32>
    %162 = arith.subf %136, %161 : vector<8x32xf32>
    %163 = vector.broadcast %141 : vector<1x32xf32> to vector<8x32xf32>
    %164 = arith.mulf %163, %162 : vector<8x32xf32>
    %cst_59 = arith.constant 9.99999997E-7 : f32
    %165 = vector.broadcast %cst_59 : f32 to vector<8x1xf32>
    %166 = arith.addf %160, %165 : vector<8x1xf32>
    %167 = tpu.reciprocal %166 {approx = true} : vector<8x1xf32> -> vector<8x1xf32>
    %168 = vector.broadcast %167 : vector<8x1xf32> to vector<8x32xf32>
    %169 = arith.mulf %164, %168 : vector<8x32xf32>
    %170 = vector.broadcast %142 : vector<1x32xf32> to vector<8x32xf32>
    %171 = arith.addf %169, %170 : vector<8x32xf32>
    %c1_60 = arith.constant 1 : index
    %c0_61 = arith.constant 0 : index
    %c0_62 = arith.constant 0 : index
    %172 = vector.load %arg2[%c1_60, %c0_61, %c0_62] : memref<2x32x96xf32, #tpu.memory_space<vmem>>, vector<1x32x96xf32>
    %173 = vector.shape_cast %172 : vector<1x32x96xf32> to vector<32x96xf32>
    %cst_63 = arith.constant dense<0.000000e+00> : vector<8x96xf32>
    %174 = tpu.matmul %171, %173, %cst_63 {dimension_numbers = #tpu.dot_dimension_numbers<[1], [0], [0], [1], [0, 0, 1, 1], [], []>} : vector<8x32xf32>, vector<32x96xf32>, vector<8x96xf32> -> vector<8x96xf32>
    %175 = vector.broadcast %137 : vector<1x96xf32> to vector<8x96xf32>
    %176 = arith.addf %174, %175 : vector<8x96xf32>
    %177 = vector.extract_strided_slice %176 {offsets = [0, 0], sizes = [8, 8], strides = [1, 1]} : vector<8x96xf32> to vector<8x8xf32>
    %178 = vector.shape_cast %177 : vector<8x8xf32> to vector<1x8x8xf32>
    %179 = vector.extract_strided_slice %176 {offsets = [0, 8], sizes = [8, 8], strides = [1, 1]} : vector<8x96xf32> to vector<8x8xf32>
    %180 = vector.shape_cast %179 : vector<8x8xf32> to vector<1x8x8xf32>
    %181 = vector.extract_strided_slice %176 {offsets = [0, 16], sizes = [8, 8], strides = [1, 1]} : vector<8x96xf32> to vector<8x8xf32>
    %182 = vector.shape_cast %181 : vector<8x8xf32> to vector<1x8x8xf32>
    %183 = vector.extract_strided_slice %176 {offsets = [0, 24], sizes = [8, 8], strides = [1, 1]} : vector<8x96xf32> to vector<8x8xf32>
    %184 = vector.shape_cast %183 : vector<8x8xf32> to vector<1x8x8xf32>
    %185 = tpu.concatenate %178, %180, %182, %184 in 0 : vector<1x8x8xf32>, vector<1x8x8xf32>, vector<1x8x8xf32>, vector<1x8x8xf32> -> vector<4x8x8xf32>
    %186 = vector.extract_strided_slice %176 {offsets = [0, 32], sizes = [8, 8], strides = [1, 1]} : vector<8x96xf32> to vector<8x8xf32>
    %187 = vector.shape_cast %186 : vector<8x8xf32> to vector<1x8x8xf32>
    %188 = vector.extract_strided_slice %176 {offsets = [0, 40], sizes = [8, 8], strides = [1, 1]} : vector<8x96xf32> to vector<8x8xf32>
    %189 = vector.shape_cast %188 : vector<8x8xf32> to vector<1x8x8xf32>
    %190 = vector.extract_strided_slice %176 {offsets = [0, 48], sizes = [8, 8], strides = [1, 1]} : vector<8x96xf32> to vector<8x8xf32>
    %191 = vector.shape_cast %190 : vector<8x8xf32> to vector<1x8x8xf32>
    %192 = vector.extract_strided_slice %176 {offsets = [0, 56], sizes = [8, 8], strides = [1, 1]} : vector<8x96xf32> to vector<8x8xf32>
    %193 = vector.shape_cast %192 : vector<8x8xf32> to vector<1x8x8xf32>
    %194 = tpu.concatenate %187, %189, %191, %193 in 0 : vector<1x8x8xf32>, vector<1x8x8xf32>, vector<1x8x8xf32>, vector<1x8x8xf32> -> vector<4x8x8xf32>
    %195 = vector.extract_strided_slice %176 {offsets = [0, 64], sizes = [8, 8], strides = [1, 1]} : vector<8x96xf32> to vector<8x8xf32>
    %196 = vector.shape_cast %195 : vector<8x8xf32> to vector<1x8x8xf32>
    %197 = vector.extract_strided_slice %176 {offsets = [0, 72], sizes = [8, 8], strides = [1, 1]} : vector<8x96xf32> to vector<8x8xf32>
    %198 = vector.shape_cast %197 : vector<8x8xf32> to vector<1x8x8xf32>
    %199 = vector.extract_strided_slice %176 {offsets = [0, 80], sizes = [8, 8], strides = [1, 1]} : vector<8x96xf32> to vector<8x8xf32>
    %200 = vector.shape_cast %199 : vector<8x8xf32> to vector<1x8x8xf32>
    %201 = vector.extract_strided_slice %176 {offsets = [0, 88], sizes = [8, 8], strides = [1, 1]} : vector<8x96xf32> to vector<8x8xf32>
    %202 = vector.shape_cast %201 : vector<8x8xf32> to vector<1x8x8xf32>
    %203 = tpu.concatenate %196, %198, %200, %202 in 0 : vector<1x8x8xf32>, vector<1x8x8xf32>, vector<1x8x8xf32>, vector<1x8x8xf32> -> vector<4x8x8xf32>
    "tpu.trace_start"() <{level = 10 : i32, message = "bqd,bkd->bqk"}> : () -> ()
    %cst_64 = arith.constant dense<0.000000e+00> : vector<4x8x8xf32>
    %204 = tpu.matmul %185, %194, %cst_64 {dimension_numbers = #tpu.dot_dimension_numbers<[2], [2], [1], [1], [0, 0, 0, 1, 1, 1], [0], [0]>} : vector<4x8x8xf32>, vector<4x8x8xf32>, vector<4x8x8xf32> -> vector<4x8x8xf32>
    "tpu.trace_stop"() : () -> ()
    %cst_65 = arith.constant 0.353553385 : f32
    %205 = vector.broadcast %cst_65 : f32 to vector<4x8x8xf32>
    %206 = arith.mulf %204, %205 : vector<4x8x8xf32>
    %cst_66 = arith.constant dense<0xFF800000> : vector<4x8xf32>
    %207 = vector.multi_reduction <maximumf>, %206, %cst_66 [2] : vector<4x8x8xf32> to vector<4x8xf32>
    %208 = vector.shape_cast %207 : vector<4x8xf32> to vector<4x8x1xf32>
    %209 = vector.broadcast %208 : vector<4x8x1xf32> to vector<4x8x8xf32>
    %210 = arith.subf %206, %209 : vector<4x8x8xf32>
    %211 = math.exp %210 : vector<4x8x8xf32>
    %cst_67 = arith.constant dense<0.000000e+00> : vector<4x8xf32>
    %212 = vector.multi_reduction <add>, %211, %cst_67 [2] : vector<4x8x8xf32> to vector<4x8xf32>
    %213 = vector.shape_cast %212 : vector<4x8xf32> to vector<4x8x1xf32>
    %214 = tpu.reciprocal %213 {approx = true} : vector<4x8x1xf32> -> vector<4x8x1xf32>
    %215 = vector.broadcast %214 : vector<4x8x1xf32> to vector<4x8x8xf32>
    %216 = arith.mulf %211, %215 : vector<4x8x8xf32>
    "tpu.trace_start"() <{level = 10 : i32, message = "bqk,bkd->bqd"}> : () -> ()
    %cst_68 = arith.constant dense<0.000000e+00> : vector<4x8x8xf32>
    %217 = tpu.matmul %216, %203, %cst_68 {dimension_numbers = #tpu.dot_dimension_numbers<[2], [1], [1], [2], [0, 0, 0, 1, 1, 2], [0], [0]>} : vector<4x8x8xf32>, vector<4x8x8xf32>, vector<4x8x8xf32> -> vector<4x8x8xf32>
    "tpu.trace_stop"() : () -> ()
    %218 = vector.extract_strided_slice %217 {offsets = [0, 0, 0], sizes = [1, 8, 8], strides = [1, 1, 1]} : vector<4x8x8xf32> to vector<1x8x8xf32>
    %219 = vector.shape_cast %218 : vector<1x8x8xf32> to vector<8x8xf32>
    %220 = vector.extract_strided_slice %217 {offsets = [1, 0, 0], sizes = [1, 8, 8], strides = [1, 1, 1]} : vector<4x8x8xf32> to vector<1x8x8xf32>
    %221 = vector.shape_cast %220 : vector<1x8x8xf32> to vector<8x8xf32>
    %222 = vector.extract_strided_slice %217 {offsets = [2, 0, 0], sizes = [1, 8, 8], strides = [1, 1, 1]} : vector<4x8x8xf32> to vector<1x8x8xf32>
    %223 = vector.shape_cast %222 : vector<1x8x8xf32> to vector<8x8xf32>
    %224 = vector.extract_strided_slice %217 {offsets = [3, 0, 0], sizes = [1, 8, 8], strides = [1, 1, 1]} : vector<4x8x8xf32> to vector<1x8x8xf32>
    %225 = vector.shape_cast %224 : vector<1x8x8xf32> to vector<8x8xf32>
    %226 = tpu.concatenate %219, %221, %223, %225 in 1 : vector<8x8xf32>, vector<8x8xf32>, vector<8x8xf32>, vector<8x8xf32> -> vector<8x32xf32>
    %c1_69 = arith.constant 1 : index
    %c0_70 = arith.constant 0 : index
    %c0_71 = arith.constant 0 : index
    %227 = vector.load %arg3[%c1_69, %c0_70, %c0_71] : memref<2x32x32xf32, #tpu.memory_space<vmem>>, vector<1x32x32xf32>
    %228 = vector.shape_cast %227 : vector<1x32x32xf32> to vector<32x32xf32>
    %cst_72 = arith.constant dense<0.000000e+00> : vector<8x32xf32>
    %229 = tpu.matmul %226, %228, %cst_72 {dimension_numbers = #tpu.dot_dimension_numbers<[1], [0], [0], [1], [0, 0, 1, 1], [], []>} : vector<8x32xf32>, vector<32x32xf32>, vector<8x32xf32> -> vector<8x32xf32>
    %230 = arith.addf %136, %229 : vector<8x32xf32>
    %231 = vector.broadcast %138 : vector<1x32xf32> to vector<8x32xf32>
    %232 = arith.addf %230, %231 : vector<8x32xf32>
    %cst_73 = arith.constant dense<0.000000e+00> : vector<8xf32>
    %233 = vector.multi_reduction <add>, %232, %cst_73 [1] : vector<8x32xf32> to vector<8xf32>
    %234 = vector.shape_cast %233 : vector<8xf32> to vector<8x1xf32>
    %235 = arith.mulf %232, %232 : vector<8x32xf32>
    %cst_74 = arith.constant dense<0.000000e+00> : vector<8xf32>
    %236 = vector.multi_reduction <add>, %235, %cst_74 [1] : vector<8x32xf32> to vector<8xf32>
    %237 = vector.shape_cast %236 : vector<8xf32> to vector<8x1xf32>
    %cst_75 = arith.constant 3.125000e-02 : f32
    %238 = vector.broadcast %cst_75 : f32 to vector<8x1xf32>
    %239 = arith.mulf %234, %238 : vector<8x1xf32>
    %cst_76 = arith.constant 3.200000e+01 : f32
    %240 = vector.broadcast %cst_76 : f32 to vector<8x1xf32>
    %241 = arith.mulf %240, %239 : vector<8x1xf32>
    %242 = arith.mulf %241, %239 : vector<8x1xf32>
    %243 = arith.subf %237, %242 : vector<8x1xf32>
    %cst_77 = arith.constant 0.0322580636 : f32
    %244 = vector.broadcast %cst_77 : f32 to vector<8x1xf32>
    %245 = arith.mulf %243, %244 : vector<8x1xf32>
    %cst_78 = arith.constant 0.000000e+00 : f32
    %246 = vector.broadcast %cst_78 : f32 to vector<8x1xf32>
    %247 = arith.maximumf %245, %246 : vector<8x1xf32>
    %248 = math.sqrt %247 : vector<8x1xf32>
    %249 = vector.broadcast %239 : vector<8x1xf32> to vector<8x32xf32>
    %250 = arith.subf %232, %249 : vector<8x32xf32>
    %251 = vector.broadcast %143 : vector<1x32xf32> to vector<8x32xf32>
    %252 = arith.mulf %251, %250 : vector<8x32xf32>
    %cst_79 = arith.constant 9.99999997E-7 : f32
    %253 = vector.broadcast %cst_79 : f32 to vector<8x1xf32>
    %254 = arith.addf %248, %253 : vector<8x1xf32>
    %255 = tpu.reciprocal %254 {approx = true} : vector<8x1xf32> -> vector<8x1xf32>
    %256 = vector.broadcast %255 : vector<8x1xf32> to vector<8x32xf32>
    %257 = arith.mulf %252, %256 : vector<8x32xf32>
    %258 = vector.broadcast %144 : vector<1x32xf32> to vector<8x32xf32>
    %259 = arith.addf %257, %258 : vector<8x32xf32>
    %c1_80 = arith.constant 1 : index
    %c0_81 = arith.constant 0 : index
    %c0_82 = arith.constant 0 : index
    %260 = vector.load %arg4[%c1_80, %c0_81, %c0_82] : memref<2x32x64xf32, #tpu.memory_space<vmem>>, vector<1x32x64xf32>
    %261 = vector.shape_cast %260 : vector<1x32x64xf32> to vector<32x64xf32>
    %cst_83 = arith.constant dense<0.000000e+00> : vector<8x64xf32>
    %262 = tpu.matmul %259, %261, %cst_83 {dimension_numbers = #tpu.dot_dimension_numbers<[1], [0], [0], [1], [0, 0, 1, 1], [], []>} : vector<8x32xf32>, vector<32x64xf32>, vector<8x64xf32> -> vector<8x64xf32>
    %263 = vector.broadcast %139 : vector<1x64xf32> to vector<8x64xf32>
    %264 = arith.addf %262, %263 : vector<8x64xf32>
    %cst_84 = arith.constant 0.000000e+00 : f32
    %265 = vector.broadcast %cst_84 : f32 to vector<8x64xf32>
    %266 = arith.maximumf %264, %265 : vector<8x64xf32>
    %c1_85 = arith.constant 1 : index
    %c0_86 = arith.constant 0 : index
    %c0_87 = arith.constant 0 : index
    %267 = vector.load %arg5[%c1_85, %c0_86, %c0_87] : memref<2x64x32xf32, #tpu.memory_space<vmem>>, vector<1x64x32xf32>
    %268 = vector.shape_cast %267 : vector<1x64x32xf32> to vector<64x32xf32>
    %cst_88 = arith.constant dense<0.000000e+00> : vector<8x32xf32>
    %269 = tpu.matmul %266, %268, %cst_88 {dimension_numbers = #tpu.dot_dimension_numbers<[1], [0], [0], [1], [0, 0, 1, 1], [], []>} : vector<8x64xf32>, vector<64x32xf32>, vector<8x32xf32> -> vector<8x32xf32>
    %270 = arith.addf %232, %269 : vector<8x32xf32>
    %271 = vector.broadcast %140 : vector<1x32xf32> to vector<8x32xf32>
    %272 = arith.addf %270, %271 : vector<8x32xf32>
    %c16 = arith.constant 16 : index
    %c0_89 = arith.constant 0 : index
    %273 = vector.load %arg6[%c16, %c0_89] : memref<18x128xf32, #tpu.memory_space<vmem>>, vector<1x32xf32>
    %c17 = arith.constant 17 : index
    %c0_90 = arith.constant 0 : index
    %274 = vector.load %arg6[%c17, %c0_90] : memref<18x128xf32, #tpu.memory_space<vmem>>, vector<1x32xf32>
    %cst_91 = arith.constant dense<0.000000e+00> : vector<8xf32>
    %275 = vector.multi_reduction <add>, %272, %cst_91 [1] : vector<8x32xf32> to vector<8xf32>
    %276 = vector.shape_cast %275 : vector<8xf32> to vector<8x1xf32>
    %277 = arith.mulf %272, %272 : vector<8x32xf32>
    %cst_92 = arith.constant dense<0.000000e+00> : vector<8xf32>
    %278 = vector.multi_reduction <add>, %277, %cst_92 [1] : vector<8x32xf32> to vector<8xf32>
    %279 = vector.shape_cast %278 : vector<8xf32> to vector<8x1xf32>
    %cst_93 = arith.constant 3.125000e-02 : f32
    %280 = vector.broadcast %cst_93 : f32 to vector<8x1xf32>
    %281 = arith.mulf %276, %280 : vector<8x1xf32>
    %cst_94 = arith.constant 3.200000e+01 : f32
    %282 = vector.broadcast %cst_94 : f32 to vector<8x1xf32>
    %283 = arith.mulf %282, %281 : vector<8x1xf32>
    %284 = arith.mulf %283, %281 : vector<8x1xf32>
    %285 = arith.subf %279, %284 : vector<8x1xf32>
    %cst_95 = arith.constant 0.0322580636 : f32
    %286 = vector.broadcast %cst_95 : f32 to vector<8x1xf32>
    %287 = arith.mulf %285, %286 : vector<8x1xf32>
    %cst_96 = arith.constant 0.000000e+00 : f32
    %288 = vector.broadcast %cst_96 : f32 to vector<8x1xf32>
    %289 = arith.maximumf %287, %288 : vector<8x1xf32>
    %290 = math.sqrt %289 : vector<8x1xf32>
    %291 = vector.broadcast %281 : vector<8x1xf32> to vector<8x32xf32>
    %292 = arith.subf %272, %291 : vector<8x32xf32>
    %293 = vector.broadcast %273 : vector<1x32xf32> to vector<8x32xf32>
    %294 = arith.mulf %293, %292 : vector<8x32xf32>
    %cst_97 = arith.constant 9.99999997E-7 : f32
    %295 = vector.broadcast %cst_97 : f32 to vector<8x1xf32>
    %296 = arith.addf %290, %295 : vector<8x1xf32>
    %297 = tpu.reciprocal %296 {approx = true} : vector<8x1xf32> -> vector<8x1xf32>
    %298 = vector.broadcast %297 : vector<8x1xf32> to vector<8x32xf32>
    %299 = arith.mulf %294, %298 : vector<8x32xf32>
    %300 = vector.broadcast %274 : vector<1x32xf32> to vector<8x32xf32>
    %301 = arith.addf %299, %300 : vector<8x32xf32>
    %c0_98 = arith.constant 0 : index
    %c0_99 = arith.constant 0 : index
    %302 = vector.load %arg7[%c0_98, %c0_99] : memref<8x32xf32, #tpu.memory_space<vmem>>, vector<8x32xf32>
    tpu.vector_store %arg7[%c0_98, %c0_99], %301 {strides = array<i32>} : memref<8x32xf32, #tpu.memory_space<vmem>>, vector<8x32xf32>,
    return
  }
  func.func @transform_0(%arg0: i32) -> (i32, i32) {
    %c0_i32 = arith.constant 0 : i32
    %c0_i32_0 = arith.constant 0 : i32
    return %arg0, %c0_i32 : i32, i32
  }
  func.func @transform_1(%arg0: i32) -> (i32, i32, i32) {
    %c0_i32 = arith.constant 0 : i32
    %c0_i32_0 = arith.constant 0 : i32
    %c0_i32_1 = arith.constant 0 : i32
    %c0_i32_2 = arith.constant 0 : i32
    return %c0_i32, %c0_i32_0, %c0_i32_1 : i32, i32, i32
  }
  func.func @transform_2(%arg0: i32) -> (i32, i32, i32) {
    %c0_i32 = arith.constant 0 : i32
    %c0_i32_0 = arith.constant 0 : i32
    %c0_i32_1 = arith.constant 0 : i32
    %c0_i32_2 = arith.constant 0 : i32
    return %c0_i32, %c0_i32_0, %c0_i32_1 : i32, i32, i32
  }
  func.func @transform_3(%arg0: i32) -> (i32, i32, i32) {
    %c0_i32 = arith.constant 0 : i32
    %c0_i32_0 = arith.constant 0 : i32
    %c0_i32_1 = arith.constant 0 : i32
    %c0_i32_2 = arith.constant 0 : i32
    return %c0_i32, %c0_i32_0, %c0_i32_1 : i32, i32, i32
  }
  func.func @transform_4(%arg0: i32) -> (i32, i32, i32) {
    %c0_i32 = arith.constant 0 : i32
    %c0_i32_0 = arith.constant 0 : i32
    %c0_i32_1 = arith.constant 0 : i32
    %c0_i32_2 = arith.constant 0 : i32
    return %c0_i32, %c0_i32_0, %c0_i32_1 : i32, i32, i32
  }
  func.func @transform_5(%arg0: i32) -> (i32, i32) {
    %c0_i32 = arith.constant 0 : i32
    %c0_i32_0 = arith.constant 0 : i32
    %c0_i32_1 = arith.constant 0 : i32
    return %c0_i32, %c0_i32_0 : i32, i32
  }
  func.func @transform_6(%arg0: i32) -> (i32, i32) {
    %c0_i32 = arith.constant 0 : i32
    %c0_i32_0 = arith.constant 0 : i32
    return %arg0, %c0_i32 : i32, i32
  }
}

</mosaic_0001>

<bundles_post_ra>
// kernel: encoder_forward.1
= control target key start
LH: loop header
LB: loop body
LE: loop exit
PB: predicated region body
PF: predicated region fallthrough
CT: control target
= control target key end

     0   :  { %11 = vsyncpa [#allocation3], 0  ;;  %s3863_s0 = inlined_call_operand.hbm [shape: f32[16,32], index: 0, kind: input, shape index: {}]   ;;  %s3864_s1 = inlined_call_operand.vmem [shape: f32[2,32,96], index: 1, kind: input, shape index: {}]   ;;  %s3865_s2 = inlined_call_operand.vmem [shape: f32[2,32,32], index: 2, kind: input, shape index: {}]   ;;  %s3866_s3 = inlined_call_operand.vmem [shape: f32[2,32,64], index: 3, kind: input, shape index: {}]   ;;  %s3867_s4 = inlined_call_operand.vmem [shape: f32[2,64,32], index: 4, kind: input, shape index: {}]   ;;  %s3868_s5 = inlined_call_operand.hbm [shape: f32[18,128], index: 5, kind: input, shape index: {}]   ;;  %s3869_s6 = inlined_call_operand.hbm [shape: f32[16,32], index: 6, kind: output, shape index: {}]  }
   0x1   :  { %13 = vsyncpa [#allocation3 + $0x1], 0 }
   0x2   :  { %14 = vsyncpa [#allocation6], 0 }
   0x3   :  { %15 = vsyncpa [#allocation4], 0 }
   0x4   :  { %17 = vsyncpa [#allocation4 + $0x1], 0  ;;  %s3308_s21 = smov 0   ;;  %s3310_s22 = smov 0  }
   0x5   :  { %s3312_s23 = smov 0   ;;  %s3314_s24 = smov 0  }
   0x6 LB: > { %s3329_s25 = sadd.s32 4294967295, %s3255_s24   ;;  %s2597_s26 = sadd.s32 4294967294, %s3255_s24   ;;  %s3255_s24 = sphi %s3314_s24, %s3897_s24   ;;  %s3251_s23 = sphi %s3312_s23, %s3896_s23   ;;  %s3247_s22 = sphi %s3310_s22, %s3895_s22   ;;  %s3243_s21 = sphi %s3308_s21, %s3894_s21  }
   0x7   : > { %p43_p0 = scmp.ne.s32.totalorder %s3247_s22, %s3243_s21  ;;  %p3870_p1 = scmp.eq.s32.totalorder %s3329_s25, 0 }
   0x8   : > { %p178_p3 = scmp.eq.s32.totalorder %s2597_s26, 1  ;;  %p2598_p5 = scmp.ge.s32.totalorder %s3255_s24, 1 }
   0x9   : > { %p3338_p4 = por %p3870_p1, %p43_p0  ;;  %p185_p7 = scmp.lt.s32.totalorder %s3255_s24, 3 }
   0xa   : > { %p3343_p6 = por %p178_p3, %p43_p0  ;;  %s3257_s30 = smov [#allocation5]  }
   0xb   : > { %s3877_s27 = scalar_select %p3338_p4, 1, 0 }
   0xc   : > { %s3878_s28 = scalar_select %p3343_p6, 1, 0 }
   0xd   : > { %p3348_p8 = pnand %p2598_p5, %p185_p7  ;;  %s209_s7 = sshll.u32 %s3257_s30, 4  ;;  %s3352_s7 = int_to_ptr.vmem [resolvable:$true] %s209_s7 }
   0xe   : > { %s3364_s9 = sadd.s32 1, %s3255_s24   ;;  %s30_s10 = sadd.s32 1, %s3251_s23 }
   0xf   : > { %s3879_s29 = scalar_select %p3348_p8, 1, 0 }
  0x10   : > { %p3013_p9 = pneg %p3348_p8  ;;  %s27_s11 = ssub.s32 %s3255_s24, %s3364_s9 }
  0x11   : > { %s3127_s14 = scalar_lea.hbm %s3868_s5, 384 }
  0x12   : > { %p3359_p11 = pnand %p3013_p9, %p3870_p1  ;;  %p3128_p12 = scmp.ne.s32.totalorder %s3868_s5, %s3127_s14 }
  0x13   : > { %p3134_p5 = scmp.lt.u32.totalorder %s3127_s14, %s3868_s5 }
  0x14   : > { %p3129_p13 = pneg %p3359_p11 }
  0x16   : > { %p3130_p0 = pnand %p3129_p13, %p3128_p12 }
  0x18   : > { %p3131_p3 = pneg %p3130_p0 }
  0x1a   : > { %p3136_p7 = pnand %p3134_p5, %p3131_p3 }
  0x1c   : > { %3139 = shalt.err (!%p3136_p7)
}
  0x1d   : > { %s3140_s19 = scalar_lea.vmem %s3352_s7, 384  ;;  %p3148_p2 = scmp.lt.s32.totalorder %s3352_s7, %s3352_s7 }
  0x1e   : > { %p3141_p9 = scmp.ne.s32.totalorder %s3352_s7, %s3140_s19  ;;  %p3149_p6 = scmp.lt.s32.totalorder %s3140_s19, %s3140_s19 }
  0x20   : > { %p3143_p10 = pnand %p3141_p9, %p3129_p13  ;;  %p3150_p4 = por %p3149_p6, %p3148_p2 }
  0x22   : > { %p3144_p1 = pneg %p3143_p10 }
  0x24   : > { %p3151_p8 = pnand %p3150_p4, %p3144_p1 }
  0x26   : > { %3154 = shalt.err (!%p3151_p8)
}
  0x27   : > { %s3258_s20 = smov 128   ;;  %s3259_s26 = smov 8  }
  0x28   : > { %3016 = dma.hbm_to_vmem [thread:$0]  (!%p3359_p11), %s3868_s5, 384, %s3352_s7, [#allocation6], %s3258_s20, %s3258_s20, %s3259_s26  }
  0x29   : > { %p28_p2 = scmp.eq.s32.totalorder %s27_s11, 0  ;;  %p37_p1 = scmp.ne.s32.totalorder %s3251_s23, %s3247_s22 }
  0x2a   : > { %p38_p4 = scmp.eq.s32.totalorder %s3255_s24, 0  ;;  %p3026_p6 = scmp.lt.s32.totalorder %s3255_s24, 2 }
  0x2b   : > { %s3395_s13 = scalar_select %p28_p2, %s3251_s23, %s30_s10  }
  0x2c   : > { %p39_p8 = por %p38_p4, %p37_p1  ;;  %p3881_p10 = scmp.eq.s32.totalorder %s3329_s25, 1 }
  0x2d   : > { %s223_s15 = sand.u32 1, %s3251_s23   ;;  %s2602_s16 = sshll.u32 %s3255_s24, 7 }
  0x2e   : > { %p3399_p12 = por %p3881_p10, %p37_p1  ;;  %s2601_s17 = sshll.u32 %s223_s15, 3 }
  0x2f   : > { %s3408_s19 = scalar_lea.hbm %s3863_s0, %s2602_s16  ;;  %s227_s7 = scalar_lea.vmem [#allocation2], %s2601_s17 }
  0x30   : > { %s234_s10 = sshll.u32 %s227_s7, 4  ;;  %p3410_p11 = pnand %p3026_p6, %p39_p8  ;;  %s3414_s10 = int_to_ptr.vmem [resolvable:$true] %s234_s10 }
  0x31   : > { %s224_s20 = scalar_lea.sflag [#allocation3], %s223_s15  ;;  %s3155_s26 = scalar_lea.hbm %s3408_s19, 128 }
  0x32   : > { %p3156_p13 = scmp.ne.s32.totalorder %s3408_s19, %s3155_s26  ;;  %p3157_p0 = pneg %p3410_p11 }
  0x33   : > { %s3160_s16 = scalar_lea.hbm %s3863_s0, 256  ;;  %p3161_p7 = scmp.lt.u32.totalorder %s3408_s19, %s3863_s0 }
  0x34   : > { %p3158_p3 = pnand %p3157_p0, %p3156_p13  ;;  %p3162_p9 = scmp.lt.u32.totalorder %s3160_s16, %s3155_s26 }
  0x35   : > { %p3164_p1 = scmp.lt.u32.totalorder %s3155_s26, %s3408_s19 }
  0x36   : > { %p3159_p5 = pneg %p3158_p3  ;;  %p3163_p2 = por %p3162_p9, %p3161_p7 }
  0x38   : > { %p3165_p4 = por %p3164_p1, %p3163_p2 }
  0x3a   : > { %p3166_p6 = pnand %p3165_p4, %p3159_p5 }
  0x3c   : > { %3169 = shalt.err (!%p3166_p6)
}
  0x3d   : > { %s3170_s15 = scalar_lea.vmem %s3414_s10, 128  ;;  %s3260_s18 = smov [#allocation2]  }
  0x3e   : > { %p3171_p8 = scmp.ne.s32.totalorder %s3414_s10, %s3170_s15  ;;  %s3175_s7 = sshll.u32 %s3260_s18, 4  ;;  %s3176_s7 = int_to_ptr.vmem [resolvable:$false] %s3175_s7 }
  0x3f   : > { %s3177_s30 = scalar_lea.vmem %s3176_s7, 256  ;;  %p3178_p3 = scmp.lt.s32.totalorder %s3414_s10, %s3176_s7 }
  0x40   : > { %p3173_p10 = pnand %p3171_p8, %p3157_p0  ;;  %p3179_p7 = scmp.lt.s32.totalorder %s3177_s30, %s3170_s15 }
  0x42   : > { %p3174_p13 = pneg %p3173_p10  ;;  %p3180_p9 = por %p3179_p7, %p3178_p3 }
  0x44   : > { %p3181_p2 = pnand %p3180_p9, %p3174_p13 }
  0x46   : > { %3184 = shalt.err (!%p3181_p2)
}
  0x47   : > { %3020 = dma.hbm_to_vmem [thread:$0]  (!%p3410_p11), %s3408_s19, 128, %s3414_s10, %s224_s20  }
  0x48   : > { %p3884_p5 = scmp.ne.s32.totalorder %s3879_s29, 0 }
  0x49   : > { %s3444_s26 = sand.u32 (!%p3884_p5), 1, %s3247_s22   ;;  %p3885_p0 = scmp.ne.s32.totalorder (!%p3884_p5), %s3877_s27, 0 }
  0x4a   : > { %243 = sbr.rel (%p3884_p5) target bundleno = 4950 (0x1356), region = 44  ;;  %s3873_s12 = sshll.u32 (!%p3884_p5), %s3444_s26, 3 }
  0x4b   : > { %s246_s16 = scalar_lea.sflag (!%p3884_p5), [#allocation3], %s3444_s26  ;;  %s249_s17 = scalar_lea.vmem (!%p3884_p5), [#allocation2], %s3873_s12 }
  0x51   : > { %3230 = dma.done.wait (%p3885_p0), %s246_s16, 128  }
  0x52   : > { %3232 = vsyncadd (%p3885_p0), %s246_s16, 4294967168  ;;  %p3886_p11 = scmp.eq.s32.totalorder %s3329_s25, 0 }
  0x54   : > { %3234 = dma.done.wait (%p3886_p11), [#allocation6], 384   ;;  %p3887_p1 = pmov %p3886_p11 }
  0x55   : > { %vm291_vm0 = vcmask 261120   ;;  %v3458_v0 = vld [vmem:[%s249_s17] sm:$0xff]  ;;  %v328_v6 = vld [vmem:[%s3864_s1 + $0x10] sm:$0xff]  ;;  %v3261_v7 = vmov 0.0|0.0   ;;  %v329_v9 = vld [vmem:[%s3864_s1 + $0x18] sm:$0xff]  ;;  %vm3262_vm1 = vmmov 0  }
  0x56   : > { %3236 = vsyncadd (%p3887_p1), [#allocation6], 4294966912  ;;  %v292_v1 = vsel %vm291_vm0, %v3458_v0, 0.0  ;;  %v295_v2 = vmul.f32 %v3458_v0, %v3458_v0  ;;  %v326_v4 = vld [vmem:[%s3864_s1] sm:$0xff]  ;;  %v327_v5 = vld [vmem:[%s3864_s1 + $0x8] sm:$0xff]  ;;  %2945 = vmatprep.subr.bf16.mxu1 %v3261_v7  ;;  %v3263_v10 = vmov 0.0   ;;  %v2949_v11 = vpack.c.bf16 %v329_v9, %v328_v6 }
  0x57   : > { %293 = vadd.xlane.f32.xlu0 %v292_v1  ;;  %v2946_v8 = vpack.c.bf16 %v327_v5, %v326_v4  ;;  %2769 = vmatprep.mubr.msk.f32.mxu1 %vm3262_vm1, %v3263_v10  ;;  %v2607_v27 = vld [vmem:[#allocation5 + $0x4] ss:$0 sm:$0xff]  ;;  %v2608_v30 = vld [vmem:[#allocation5 + $0x5] ss:$0 sm:$0xff]  ;;  %v2609_v33 = vld [vmem:[#allocation5] ss:$0 sm:$0xff] }
  0x58   : > { %v296_v3 = vsel %vm291_vm0, %v295_v2, 0.0  ;;  %2782 = vmatprep.subr.mxu0 %v3263_v10  ;;  %2784 = vmatprep.mubr.msk.f32.mxu0 %vm3262_vm1, %v3263_v10  ;;  %s3264_s18 = smov 104   ;;  %s3265_s7 = smov 120   ;;  %vm416_vm4 = vcmask 64512   ;;  %vm1084_vm5 = vcmask 130048   ;;  %vm1086_vm6 = vcmask 195584  }
  0x59   : > { %2947 = vmatpush3.bf16.msra.mxu1 %v2946_v8  ;;  %s3266_s30 = smov 112   ;;  %s3267_s16 = smov 96   ;;  %vm1295_vm9 = vcmask 523264  }
  0x5a   : > { %2948 = vmatprep.subr.bf16.mxu1 %v3261_v7  ;;  %s3268_s17 = smov 64   ;;  %s3875_s27 = smov 8  }
  0x5b   : > { %297 = vadd.xlane.f32.xlu0 %v296_v3  ;;  %s3876_s29 = smov 16   ;;  %s3874_s19 = smov 24  }
  0x5c   : > { %s3888_s10 = smov 16   ;;  %s3889_s11 = smov 8  }
  0x5d   : > { %2950 = vmatpush3.bf16.msra.mxu1 %v2949_v11  ;;  %s3890_s20 = smov 24  }
  0x5e   : > { %2772 = vmatprep.subr.mxu1 %v3263_v10 }
  0xe4   : > { %v294_v12 = vpop.xlane.xlu0 %293 }
  0xe5   : > { %v299_v13 = vmul.f32 0.03125, %v294_v12 }
  0xe7   : > { %v300_v14 = vmul.f32 32.0, %v299_v13  ;;  %v312_v26 = vsub.f32 %v3458_v0, %v299_v13 }
  0xe8   : > { %v298_v15 = vpop.xlane.xlu0 %297 }
  0xe9   : > { %v301_v16 = vmul.f32 %v300_v14, %v299_v13  ;;  %v317_v28 = vmul.f32 %v2607_v27, %v312_v26 }
  0xeb   : > { %v302_v17 = vsub.f32 %v298_v15, %v301_v16 }
  0xed   : > { %v303_v18 = vmul.f32 0.032258064, %v302_v17 }
  0xef   : > { %v304_v19 = vmax.f32 %v303_v18, 0.0 }
  0xf1   : > { %3075 = vrsqrt.f32 %v304_v19  ;;  %vm307_vm2 = vcmp.eq.f32.partialorder %v304_v19, inf  ;;  %v310_v22 = vand.u32 2147483648, %v304_v19  ;;  %vm309_vm3 = vcmp.eq.f32.partialorder %v304_v19, 0.0 }
  0xfb   : > { %v3076_v20 = vpop.eup %3075 }
  0xfc   : > { %v306_v21 = vmul.f32 %v3076_v20, %v304_v19 }
  0xfe   : > { %v308_v23 = vsel %vm307_vm2, %v304_v19, %v306_v21 }
  0xff   : > { %v311_v24 = vsel %vm309_vm3, %v310_v22, %v308_v23 }
 0x100   : > { %v318_v25 = vadd.f32 1e-06, %v311_v24 }
 0x102   : > { %3077 = vrcp.f32 %v318_v25 }
 0x10c   : > { %v3078_v29 = vpop.eup %3077 }
 0x10d   : > { %v320_v31 = vmul.f32 %v3078_v29, %v317_v28 }
 0x10f   : > { %v325_v32 = vadd.f32 %v2608_v30, %v320_v31 }
 0x111   : > { %2770 = vmatmul.mubr.msk.f32.vlgmr.msra.gmra.mrb[0].mxu1 %vm291_vm0, %v325_v32 }
 0x112   : > { %2774 = vmatprep.mubr.msk.f32.mxu1 %vm3262_vm1, %v3263_v10 }
 0x1e4   : > { %v403_v34 = vpop.f32.mrb[0].mxu1 }
 0x1e5   : > { %v404_v35 = vadd.f32 %v2609_v33, %v403_v34  ;;  %v2771_v36 = vpop.f32.mrb[1].mxu1 }
 0x1e7   : > { %412 = vrot.lane.b32.xlu0 %v404_v35, %s3264_s18  ;;  %408 = vrot.lane.b32.xlu1 %v404_v35, %s3265_s7 }
 0x1eb   : > { %410 = vrot.lane.b32.xlu1 %v404_v35, %s3266_s30 }
 0x1ef   : > { %414 = vrot.lane.b32.xlu1 %v404_v35, %s3267_s16 }
 0x259   : > { %v3493_v37 = vpop.permute.xlu1 %408  ;;  %v3501_v39 = vpop.permute.xlu0 %412 }
 0x25a   : > { %491 = vrot.lane.b32.xlu1 %v3493_v37, %s3267_s16 }
 0x25d   : > { %v3497_v38 = vpop.permute.xlu1 %410 }
 0x25e   : > { %567 = vrot.lane.b32.xlu1 %v3497_v38, %s3267_s16 }
 0x261   : > { %v415_v40 = vpop.permute.xlu1 %414 }
 0x262   : > { %643 = vrot.lane.b32.xlu1 %v3501_v39, %s3267_s16  ;;  %2773 = vmatpush3.xpose.msk.msra.mxu1 %vm416_vm4, %v415_v40  ;;  %v1090_v40 = vld [vmem:[%s3865_s2 + $0x10] sm:$0xff] }
 0x263   : > { %2777 = vmatprep.subr.mxu1 %v3263_v10 }
 0x265   : > { %2775 = vmatmul.mubr.msk.f32.vlgmr.msra.gmra.mrb[2].mxu1 %vm416_vm4, %v404_v35 }
 0x266   : > { %2779 = vmatprep.mubr.msk.f32.mxu1 %vm3262_vm1, %v3263_v10 }
 0x2cc   : > { %v492_v41 = vpop.permute.xlu1 %491 }
 0x2cd   : > { %2778 = vmatpush3.xpose.msk.msra.mxu1 %vm416_vm4, %v492_v41  ;;  %v1091_v41 = vld [vmem:[%s3865_s2 + $0x18] sm:$0xff] }
 0x2ce   : > { %2787 = vmatprep.subr.mxu1 %v3263_v10 }
 0x2d0   : > { %2780 = vmatmul.mubr.msk.f32.vlgmr.msra.gmra.mrb[4].mxu1 %vm416_vm4, %v3493_v37  ;;  %v568_v42 = vpop.permute.xlu1 %567 }
 0x2d1   : > { %2783 = vmatpush3.xpose.msk.msra.mxu0 %vm416_vm4, %v568_v42  ;;  %2789 = vmatprep.mubr.msk.f32.mxu1 %vm3262_vm1, %v3263_v10  ;;  %v2955_v42 = vpack.c.bf16 %v1091_v41, %v1090_v40  ;;  %v2627_v40 = vld [vmem:[#allocation5 + $0x2] ss:$0 sm:$0xff] }
 0x2d2   : > { %2792 = vmatprep.subr.mxu0 %v3263_v10 }
 0x2d4   : > { %2785 = vmatmul.mubr.msk.f32.vlgmr.msra.gmra.mrb[0].mxu0 %vm416_vm4, %v3497_v38  ;;  %v644_v43 = vpop.permute.xlu1 %643 }
 0x2d5   : > { %2788 = vmatpush3.xpose.msk.msra.mxu1 %vm416_vm4, %v644_v43  ;;  %2794 = vmatprep.mubr.msk.f32.mxu0 %vm3262_vm1, %v3263_v10 }
 0x2d6   : > { %2797 = vmatprep.subr.mxu1 %v3263_v10 }
 0x2d8   : > { %2790 = vmatmul.mubr.msk.f32.vlgmr.msra.gmra.mrb[6].mxu1 %vm416_vm4, %v3501_v39 }
 0x2d9   : > { %2799 = vmatprep.mubr.msk.f32.mxu1 %vm3262_vm1, %v3263_v10 }
 0x338   : > { %v487_v44 = vpop.f32.mrb[2].mxu1 }
 0x339   : > { %v719_v45 = vmul.f32 0.35355338, %v487_v44  ;;  %v2776_v46 = vpop.f32.mrb[3].mxu1 }
 0x33b   : > { %v723_v47 = vsel %vm416_vm4, %v719_v45, -inf }
 0x33c   : > { %724 = vmax.xlane.f32.xlu1 %v723_v47 }
 0x3a3   : > { %v563_v48 = vpop.f32.mrb[4].mxu1 }
 0x3a4   : > { %v720_v49 = vmul.f32 0.35355338, %v563_v48  ;;  %v2781_v50 = vpop.f32.mrb[5].mxu1 }
 0x3a6   : > { %v726_v51 = vsel %vm416_vm4, %v720_v49, -inf }
 0x3a7   : > { %v639_v52 = vpop.f32.mrb[0].mxu0  ;;  %727 = vmax.xlane.f32.xlu0 %v726_v51 }
 0x3a8   : > { %v721_v53 = vmul.f32 0.35355338, %v639_v52  ;;  %v2786_v54 = vpop.f32.mrb[1].mxu0 }
 0x3aa   : > { %v729_v55 = vsel %vm416_vm4, %v721_v53, -inf }
 0x3ab   : > { %730 = vmax.xlane.f32.xlu1 %v729_v55  ;;  %v715_v56 = vpop.f32.mrb[6].mxu1  ;;  %v2624_v55 = vld [vmem:[#allocation5 + $0x1] ss:$0 sm:$0xff] }
 0x3ac   : > { %v722_v57 = vmul.f32 0.35355338, %v715_v56  ;;  %v2791_v58 = vpop.f32.mrb[7].mxu1 }
 0x3ae   : > { %v732_v59 = vsel %vm416_vm4, %v722_v57, -inf }
 0x3af   : > { %733 = vmax.xlane.f32.xlu0 %v732_v59 }
 0x3bc   : > { %767 = vrot.lane.b32.xlu1 %v404_v35, %s3268_s17 }
 0x3c9   : > { %v725_v60 = vpop.xlane.xlu1 %724 }
 0x3ca   : > { %v735_v61 = vsub.f32 %v719_v45, %v725_v60 }
 0x3cc   : > { %v739_v62 = vmul.f32 1.442695, %v735_v61 }
 0x3ce   : > { %3079 = vpow2.f32 %v739_v62 }
 0x3d8   : > { %v3080_v63 = vpop.eup %3079 }
 0x3d9   : > { %v747_v1 = vsel %vm416_vm4, %v3080_v63, 0.0 }
 0x3e0   : > { %748 = vadd.xlane.f32.xlu1 %v747_v1  ;;  %v1207_v1 = vld [vmem:[%s3866_s3 + $0x10] sm:$0xff] }
 0x434   : > { %v728_v2 = vpop.xlane.xlu0 %727 }
 0x435   : > { %v736_v3 = vsub.f32 %v720_v49, %v728_v2 }
 0x437   : > { %v741_v4 = vmul.f32 1.442695, %v736_v3  ;;  %v1208_v3 = vld [vmem:[%s3866_s3 + $0x18] sm:$0xff] }
 0x438   : > { %v731_v5 = vpop.xlane.xlu1 %730 }
 0x439   : > { %3081 = vpow2.f32 %v741_v4  ;;  %v737_v6 = vsub.f32 %v721_v53, %v731_v5  ;;  %v2961_v4 = vpack.c.bf16 %v1208_v3, %v1207_v1  ;;  %v1287_v5 = vld [vmem:[%s3867_s4] sm:$0xff] }
 0x43b   : > { %v743_v8 = vmul.f32 1.442695, %v737_v6  ;;  %v1288_v6 = vld [vmem:[%s3867_s4 + $0x8] sm:$0xff] }
 0x43c   : > { %v768_v9 = vpop.permute.xlu1 %767  ;;  %v734_v11 = vpop.xlane.xlu0 %733 }
 0x43d   : > { %3083 = vpow2.f32 %v743_v8  ;;  %v738_v12 = vsub.f32 %v722_v57, %v734_v11  ;;  %2793 = vmatpush3.msra.mxu0 %v768_v9  ;;  %v1289_v8 = vld [vmem:[%s3867_s4 + $0x10] sm:$0xff]  ;;  %v2964_v9 = vpack.c.bf16 %v1288_v6, %v1287_v5  ;;  %v1290_v11 = vld [vmem:[%s3867_s4 + $0x18] sm:$0xff] }
 0x43e   : > { %2802 = vmatprep.subr.mxu0 %v3263_v10 }
 0x43f   : > { %v745_v13 = vmul.f32 1.442695, %v738_v12  ;;  %v2967_v12 = vpack.c.bf16 %v1290_v11, %v1289_v8 }
 0x441   : > { %3085 = vpow2.f32 %v745_v13  ;;  %v1291_v13 = vld [vmem:[%s3867_s4 + $0x20] sm:$0xff] }
 0x443   : > { %v3082_v14 = vpop.eup %3081 }
 0x444   : > { %v750_v15 = vsel %vm416_vm4, %v3082_v14, 0.0 }
 0x445   : > { %751 = vadd.xlane.f32.xlu0 %v750_v15 }
 0x447   : > { %v3084_v16 = vpop.eup %3083 }
 0x448   : > { %v753_v17 = vsel %vm416_vm4, %v3084_v16, 0.0 }
 0x449   : > { %754 = vadd.xlane.f32.xlu1 %v753_v17 }
 0x44b   : > { %v3086_v18 = vpop.eup %3085 }
 0x44c   : > { %v756_v19 = vsel %vm416_vm4, %v3086_v18, 0.0 }
 0x44d   : > { %757 = vadd.xlane.f32.xlu0 %v756_v19 }
 0x45a   : > { %919 = vrot.lane.b32.xlu1 %v3497_v38, %s3268_s17  ;;  %v1089_v38 = vld [vmem:[%s3865_s2 + $0x8] sm:$0xff] }
 0x45e   : > { %995 = vrot.lane.b32.xlu1 %v3501_v39, %s3268_s17 }
 0x463   : > { %843 = vrot.lane.b32.xlu0 %v3493_v37, %s3268_s17  ;;  %v1088_v37 = vld [vmem:[%s3865_s2] sm:$0xff] }
 0x464   : > { %v2952_v39 = vpack.c.bf16 %v1089_v38, %v1088_v37  ;;  %v1293_v37 = vld [vmem:[%s3867_s4 + $0x30] sm:$0xff]  ;;  %v1294_v38 = vld [vmem:[%s3867_s4 + $0x38] sm:$0xff] }
 0x46d   : > { %v749_v20 = vpop.xlane.xlu1 %748 }
 0x46e   : > { %3087 = vrcp.f32 %v749_v20 }
 0x478   : > { %v3088_v21 = vpop.eup %3087 }
 0x479   : > { %v763_v22 = vmul.f32 %v3088_v21, %v3080_v63  ;;  %v1205_v63 = vld [vmem:[%s3866_s3] sm:$0xff] }
 0x47b   : > { %2795 = vmatmul.mubr.msk.f32.vlgmr.msra.gmra.mrb[2].mxu0 %vm416_vm4, %v763_v22 }
 0x47c   : > { %2804 = vmatprep.mubr.msk.f32.mxu0 %vm3262_vm1, %v3263_v10 }
 0x4d2   : > { %v752_v23 = vpop.xlane.xlu0 %751 }
 0x4d3   : > { %3089 = vrcp.f32 %v752_v23 }
 0x4d6   : > { %v755_v24 = vpop.xlane.xlu1 %754 }
 0x4d7   : > { %3091 = vrcp.f32 %v755_v24 }
 0x4da   : > { %v920_v25 = vpop.permute.xlu1 %919  ;;  %v758_v26 = vpop.xlane.xlu0 %757 }
 0x4db   : > { %3093 = vrcp.f32 %v758_v26  ;;  %2803 = vmatpush3.msra.mxu0 %v920_v25 }
 0x4dc   : > { %2951 = vmatprep.subr.bf16.mxu0 %v3261_v7 }
 0x4dd   : > { %v3090_v27 = vpop.eup %3089 }
 0x4de   : > { %v764_v28 = vmul.f32 %v3090_v27, %v3082_v14  ;;  %v844_v29 = vpop.permute.xlu0 %843  ;;  %v996_v30 = vpop.permute.xlu1 %995  ;;  %v1292_v14 = vld [vmem:[%s3867_s4 + $0x28] sm:$0xff] }
 0x4df   : > { %2798 = vmatpush3.msra.mxu1 %v844_v29  ;;  %v2970_v15 = vpack.c.bf16 %v1292_v14, %v1291_v13 }
 0x4e0   : > { %2800 = vmatmul.mubr.msk.f32.vlgmr.msra.gmra.mrb[8].mxu1 %vm416_vm4, %v764_v28  ;;  %2807 = vmatprep.subr.mxu1 %v3263_v10 }
 0x4e1   : > { %v3092_v31 = vpop.eup %3091  ;;  %2808 = vmatpush3.msra.mxu1 %v996_v30  ;;  %2809 = vmatprep.mubr.msk.f32.mxu1 %vm3262_vm1, %v3263_v10 }
 0x4e2   : > { %v765_v32 = vmul.f32 %v3092_v31, %v3084_v16  ;;  %2957 = vmatprep.subr.bf16.mxu1 %v3261_v7  ;;  %v2625_v31 = vld [vmem:[#allocation5 + $0x6] ss:$0 sm:$0xff] }
 0x4e4   : > { %2805 = vmatmul.mubr.msk.f32.vlgmr.msra.gmra.mrb[4].mxu0 %vm416_vm4, %v765_v32 }
 0x4e5   : > { %v3094_v33 = vpop.eup %3093  ;;  %2820 = vmatprep.mubr.msk.f32.mxu0 %vm3262_vm1, %v3263_v10  ;;  %2953 = vmatpush3.bf16.msra.mxu0 %v2952_v39  ;;  %v2973_v39 = vpack.c.bf16 %v1294_v38, %v1293_v37 }
 0x4e6   : > { %v766_v34 = vmul.f32 %v3094_v33, %v3086_v18  ;;  %2954 = vmatprep.subr.bf16.mxu0 %v3261_v7 }
 0x4e8   : > { %2810 = vmatmul.mubr.msk.f32.vlgmr.msra.gmra.mrb[10].mxu1 %vm416_vm4, %v766_v34  ;;  %v2626_v34 = vld [vmem:[#allocation5 + $0x7] ss:$0 sm:$0xff] }
 0x4e9   : > { %2831 = vmatprep.mubr.msk.f32.mxu1 %vm3262_vm1, %v3263_v10  ;;  %2956 = vmatpush3.bf16.msra.mxu0 %v2955_v42 }
 0x4ea   : > { %2963 = vmatprep.subr.bf16.mxu0 %v3261_v7 }
 0x54e   : > { %v839_v35 = vpop.f32.mrb[2].mxu0 }
 0x54f   : > { %v2796_v36 = vpop.f32.mrb[3].mxu0 }
 0x5b3   : > { %v915_v43 = vpop.f32.mrb[8].mxu1 }
 0x5b4   : > { %1072 = vrot.lane.b32.xlu0 %v915_v43, %s3875_s27  ;;  %v2801_v44 = vpop.f32.mrb[9].mxu1 }
 0x5b7   : > { %v991_v45 = vpop.f32.mrb[4].mxu0 }
 0x5b8   : > { %1076 = vrot.lane.b32.xlu1 %v991_v45, %s3876_s29  ;;  %v2806_v46 = vpop.f32.mrb[5].mxu0  ;;  %v2630_v45 = vld [vmem:[#allocation5 + $0x3] ss:$0 sm:$0xff] }
 0x5bb   : > { %v1067_v47 = vpop.f32.mrb[10].mxu1 }
 0x5bc   : > { %1080 = vrot.lane.b32.xlu0 %v1067_v47, %s3874_s19  ;;  %v2811_v48 = vpop.f32.mrb[11].mxu1  ;;  %s2678_s19 = sshll.u32 %s3329_s25, 7  ;;  %s3272_s25 = smov [#allocation7]  }
 0x5bd   : > { %s3818_s12 = scalar_lea.hbm %s3869_s6, %s2678_s19 }
 0x626   : > { %v1073_v49 = vpop.permute.xlu0 %1072 }
 0x627   : > { %v1083_v51 = vsel %vm416_vm4, %v839_v35, %v1073_v49 }
 0x62a   : > { %v1077_v50 = vpop.permute.xlu1 %1076 }
 0x62b   : > { %v1085_v52 = vsel %vm1084_vm5, %v1083_v51, %v1077_v50 }
 0x62e   : > { %v1081_v53 = vpop.permute.xlu0 %1080 }
 0x62f   : > { %v1087_v54 = vsel %vm1086_vm6, %v1085_v52, %v1081_v53  ;;  %v2633_v53 = vld [vmem:[%s3864_s1 + $0x20] sm:$0xff] }
 0x630   : > { %2821 = vmatmul.mubr.msk.f32.vlgmr.msra.gmra.mrb[6].mxu0 %vm291_vm0, %v1087_v54  ;;  %v2634_v54 = vld [vmem:[%s3864_s1 + $0x28] sm:$0xff] }
 0x631   : > { %2850 = vmatprep.mubr.msk.f32.mxu0 %vm3262_vm1, %v3263_v10  ;;  %2965 = vmatpush3.bf16.msra.mxu0 %v2964_v9 }
 0x632   : > { %2966 = vmatprep.subr.bf16.mxu0 %v3261_v7 }
 0x635   : > { %2968 = vmatpush3.bf16.msra.mxu0 %v2967_v12  ;;  %v2631_v12 = vld [vmem:[#allocation5 + $0xc] ss:$0 sm:$0xff] }
 0x636   : > { %2969 = vmatprep.subr.bf16.mxu0 %v3261_v7 }
 0x639   : > { %2971 = vmatpush3.bf16.msra.mxu0 %v2970_v15  ;;  %v2632_v15 = vld [vmem:[#allocation5 + $0xd] ss:$0 sm:$0xff] }
 0x63a   : > { %2972 = vmatprep.subr.bf16.mxu0 %v3261_v7 }
 0x63d   : > { %2974 = vmatpush3.bf16.msra.mxu0 %v2973_v39 }
 0x63e   : > { %2874 = vmatprep.subr.mxu0 %v3263_v10 }
 0x703   : > { %v1161_v56 = vpop.f32.mrb[6].mxu0 }
 0x704   : > { %v1165_v57 = vadd.f32 %v1161_v56, %v3458_v0  ;;  %v2822_v58 = vpop.f32.mrb[7].mxu0  ;;  %v1206_v0 = vld [vmem:[%s3866_s3 + $0x8] sm:$0xff]  ;;  %v2976_v56 = vpack.c.bf16 %v2634_v54, %v2633_v53 }
 0x705   : > { %v2958_v2 = vpack.c.bf16 %v1206_v0, %v1205_v63 }
 0x706   : > { %v3583_v59 = vadd.f32 %v2624_v55, %v1165_v57  ;;  %v2635_v55 = vld [vmem:[%s3864_s1 + $0x30] sm:$0xff]  ;;  %v2636_v57 = vld [vmem:[%s3864_s1 + $0x38] sm:$0xff] }
 0x707   : > { %2959 = vmatpush3.bf16.msra.mxu1 %v2958_v2  ;;  %v2979_v58 = vpack.c.bf16 %v2636_v57, %v2635_v55 }
 0x708   : > { %v1171_v60 = vsel %vm291_vm0, %v3583_v59, 0.0  ;;  %v1174_v61 = vmul.f32 %v3583_v59, %v3583_v59  ;;  %2960 = vmatprep.subr.bf16.mxu1 %v3261_v7 }
 0x709   : > { %1172 = vadd.xlane.f32.xlu1 %v1171_v60 }
 0x70a   : > { %v1175_v62 = vsel %vm291_vm0, %v1174_v61, 0.0 }
 0x70b   : > { %1176 = vadd.xlane.f32.xlu0 %v1175_v62  ;;  %2962 = vmatpush3.bf16.msra.mxu1 %v2961_v4 }
 0x70c   : > { %2975 = vmatprep.subr.bf16.mxu1 %v3261_v7 }
 0x796   : > { %v1173_v16 = vpop.xlane.xlu1 %1172 }
 0x797   : > { %v1178_v17 = vmul.f32 0.03125, %v1173_v16 }
 0x798   : > { %v1177_v20 = vpop.xlane.xlu0 %1176 }
 0x799   : > { %v1179_v18 = vmul.f32 32.0, %v1178_v17  ;;  %v1191_v30 = vsub.f32 %v3583_v59, %v1178_v17 }
 0x79b   : > { %v1180_v19 = vmul.f32 %v1179_v18, %v1178_v17  ;;  %v1196_v32 = vmul.f32 %v2625_v31, %v1191_v30  ;;  %v2637_v18 = vld [vmem:[#allocation5 + $0x8] ss:$0 sm:$0xff] }
 0x79d   : > { %v1181_v21 = vsub.f32 %v1177_v20, %v1180_v19 }
 0x79f   : > { %v1182_v22 = vmul.f32 0.032258064, %v1181_v21 }
 0x7a1   : > { %v1183_v23 = vmax.f32 %v1182_v22, 0.0 }
 0x7a3   : > { %3095 = vrsqrt.f32 %v1183_v23  ;;  %vm1186_vm7 = vcmp.eq.f32.partialorder %v1183_v23, inf  ;;  %v1189_v26 = vand.u32 2147483648, %v1183_v23  ;;  %vm1188_vm8 = vcmp.eq.f32.partialorder %v1183_v23, 0.0 }
 0x7ad   : > { %v3096_v24 = vpop.eup %3095 }
 0x7ae   : > { %v1185_v25 = vmul.f32 %v3096_v24, %v1183_v23 }
 0x7b0   : > { %v1187_v27 = vsel %vm1186_vm7, %v1183_v23, %v1185_v25 }
 0x7b1   : > { %v1190_v28 = vsel %vm1188_vm8, %v1189_v26, %v1187_v27 }
 0x7b2   : > { %v1197_v29 = vadd.f32 1e-06, %v1190_v28 }
 0x7b4   : > { %3097 = vrcp.f32 %v1197_v29 }
 0x7be   : > { %v3098_v33 = vpop.eup %3097 }
 0x7bf   : > { %v1199_v35 = vmul.f32 %v3098_v33, %v1196_v32 }
 0x7c1   : > { %v1204_v36 = vadd.f32 %v2626_v34, %v1199_v35 }
 0x7c3   : > { %2832 = vmatmul.mubr.msk.f32.vlgmr.msra.gmra.mrb[12].mxu1 %vm291_vm0, %v1204_v36 }
 0x7c4   : > { %2861 = vmatprep.mubr.msk.f32.mxu1 %vm3262_vm1, %v3263_v10  ;;  %2977 = vmatpush3.bf16.msra.mxu1 %v2976_v56 }
 0x7c5   : > { %2978 = vmatprep.subr.bf16.mxu1 %v3261_v7 }
 0x7c8   : > { %2980 = vmatpush3.bf16.msra.mxu1 %v2979_v58 }
 0x7c9   : > { %2864 = vmatprep.subr.mxu1 %v3263_v10 }
 0x896   : > { %v1282_v41 = vpop.f32.mrb[12].mxu1 }
 0x897   : > { %v1283_v42 = vadd.f32 %v2627_v40, %v1282_v41  ;;  %v2833_v43 = vpop.f32.mrb[13].mxu1 }
 0x899   : > { %v1286_v44 = vmax.f32 %v1283_v42, 0.0 }
 0x89b   : > { %2851 = vmatmul.mubr.msk.f32.vlgmr.msra.gmra.mrb[8].mxu0 %vm1295_vm9, %v1286_v44 }
 0x89c   : > { %2876 = vmatprep.mubr.msk.f32.mxu0 %vm3262_vm1, %v3263_v10 }
 0x96e   : > { %v1365_v46 = vpop.f32.mrb[8].mxu0 }
 0x96f   : > { %v1369_v47 = vadd.f32 %v1365_v46, %v3583_v59  ;;  %v2852_v48 = vpop.f32.mrb[9].mxu0 }
 0x971   : > { %v3640_v49 = vadd.f32 %v2630_v45, %v1369_v47 }
 0x973   : > { %v1383_v50 = vsel %vm291_vm0, %v3640_v49, 0.0  ;;  %v1386_v51 = vmul.f32 %v3640_v49, %v3640_v49 }
 0x974   : > { %1384 = vadd.xlane.f32.xlu0 %v1383_v50 }
 0x975   : > { %v1387_v52 = vsel %vm291_vm0, %v1386_v51, 0.0 }
 0x976   : > { %1388 = vadd.xlane.f32.xlu1 %v1387_v52 }
 0xa01   : > { %v1385_v59 = vpop.xlane.xlu0 %1384 }
 0xa02   : > { %v1390_v60 = vmul.f32 0.03125, %v1385_v59 }
 0xa03   : > { %v1389_v63 = vpop.xlane.xlu1 %1388 }
 0xa04   : > { %v1391_v61 = vmul.f32 32.0, %v1390_v60  ;;  %v1403_v11 = vsub.f32 %v3640_v49, %v1390_v60 }
 0xa06   : > { %v1392_v62 = vmul.f32 %v1391_v61, %v1390_v60  ;;  %v1408_v13 = vmul.f32 %v2631_v12, %v1403_v11 }
 0xa08   : > { %v1393_v0 = vsub.f32 %v1389_v63, %v1392_v62 }
 0xa0a   : > { %v1394_v1 = vmul.f32 0.032258064, %v1393_v0 }
 0xa0c   : > { %v1395_v2 = vmax.f32 %v1394_v1, 0.0 }
 0xa0e   : > { %3099 = vrsqrt.f32 %v1395_v2  ;;  %vm1398_vm10 = vcmp.eq.f32.partialorder %v1395_v2, inf  ;;  %v1401_v5 = vand.u32 2147483648, %v1395_v2  ;;  %vm1400_vm11 = vcmp.eq.f32.partialorder %v1395_v2, 0.0 }
 0xa18   : > { %v3100_v3 = vpop.eup %3099 }
 0xa19   : > { %v1397_v4 = vmul.f32 %v3100_v3, %v1395_v2 }
 0xa1b   : > { %v1399_v6 = vsel %vm1398_vm10, %v1395_v2, %v1397_v4 }
 0xa1c   : > { %v1402_v8 = vsel %vm1400_vm11, %v1401_v5, %v1399_v6 }
 0xa1d   : > { %v1409_v9 = vadd.f32 1e-06, %v1402_v8 }
 0xa1f   : > { %3101 = vrcp.f32 %v1409_v9 }
 0xa29   : > { %v3102_v14 = vpop.eup %3101 }
 0xa2a   : > { %v1411_v16 = vmul.f32 %v3102_v14, %v1408_v13 }
 0xa2c   : > { %v1416_v17 = vadd.f32 %v2632_v15, %v1411_v16 }
 0xa2e   : > { %2862 = vmatmul.mubr.msk.f32.vlgmr.msra.gmra.mrb[14].mxu1 %vm291_vm0, %v1416_v17 }
 0xa2f   : > { %2866 = vmatprep.mubr.msk.f32.mxu1 %vm3262_vm1, %v3263_v10 }
 0xb01   : > { %v1495_v19 = vpop.f32.mrb[14].mxu1 }
 0xb02   : > { %v1496_v20 = vadd.f32 %v2637_v18, %v1495_v19  ;;  %v2863_v21 = vpop.f32.mrb[15].mxu1 }
 0xb03   : > { %v2652_v21 = vld [vmem:[%s3865_s2 + $0x28] sm:$0xff] }
 0xb04   : > { %1502 = vrot.lane.b32.xlu1 %v1496_v20, %s3266_s30  ;;  %1500 = vrot.lane.b32.xlu0 %v1496_v20, %s3265_s7  ;;  %s3189_s30 = sshll.u32 %s3272_s25, 4  ;;  %s3190_s30 = int_to_ptr.vmem [resolvable:$false] %s3189_s30 }
 0xb08   : > { %1504 = vrot.lane.b32.xlu1 %v1496_v20, %s3264_s18  ;;  %1506 = vrot.lane.b32.xlu0 %v1496_v20, %s3267_s16  ;;  %s2504_s18 = scalar_lea.sflag [#allocation4], %s3444_s26 }
 0xb76   : > { %v3669_v22 = vpop.permute.xlu1 %1502  ;;  %v3671_v23 = vpop.permute.xlu0 %1500 }
 0xb77   : > { %1658 = vrot.lane.b32.xlu0 %v3669_v22, %s3267_s16  ;;  %1582 = vrot.lane.b32.xlu1 %v3671_v23, %s3267_s16 }
 0xb7a   : > { %v3677_v24 = vpop.permute.xlu1 %1504  ;;  %v1507_v25 = vpop.permute.xlu0 %1506 }
 0xb7b   : > { %1734 = vrot.lane.b32.xlu1 %v3677_v24, %s3267_s16  ;;  %2865 = vmatpush3.xpose.msk.msra.mxu1 %vm416_vm4, %v1507_v25  ;;  %v2653_v25 = vld [vmem:[%s3865_s2 + $0x30] sm:$0xff]  ;;  %s3191_s16 = scalar_lea.vmem %s3190_s30, 256 }
 0xb7c   : > { %2869 = vmatprep.subr.mxu1 %v3263_v10 }
 0xb7e   : > { %2867 = vmatmul.mubr.msk.f32.vlgmr.msra.gmra.mrb[16].mxu1 %vm416_vm4, %v1496_v20 }
 0xb7f   : > { %2871 = vmatprep.mubr.msk.f32.mxu1 %vm3262_vm1, %v3263_v10 }
 0xbe9   : > { %v1583_v26 = vpop.permute.xlu1 %1582  ;;  %v1659_v27 = vpop.permute.xlu0 %1658 }
 0xbea   : > { %2870 = vmatpush3.xpose.msk.msra.mxu1 %vm416_vm4, %v1583_v26  ;;  %2875 = vmatpush3.xpose.msk.msra.mxu0 %vm416_vm4, %v1659_v27  ;;  %v2654_v26 = vld [vmem:[%s3865_s2 + $0x38] sm:$0xff] }
 0xbeb   : > { %2879 = vmatprep.subr.mxu1 %v3263_v10  ;;  %2884 = vmatprep.subr.mxu0 %v3263_v10  ;;  %v2985_v27 = vpack.c.bf16 %v2654_v26, %v2653_v25 }
 0xbed   : > { %v1735_v28 = vpop.permute.xlu1 %1734  ;;  %2872 = vmatmul.mubr.msk.f32.vlgmr.msra.gmra.mrb[18].mxu1 %vm416_vm4, %v3671_v23  ;;  %2877 = vmatmul.mubr.msk.f32.vlgmr.msra.gmra.mrb[10].mxu0 %vm416_vm4, %v3669_v22 }
 0xbee   : > { %2880 = vmatpush3.xpose.msk.msra.mxu1 %vm416_vm4, %v1735_v28  ;;  %2881 = vmatprep.mubr.msk.f32.mxu1 %vm3262_vm1, %v3263_v10 }
 0xbef   : > { %2886 = vmatprep.mubr.msk.f32.mxu0 %vm3262_vm1, %v3263_v10  ;;  %2889 = vmatprep.subr.mxu1 %v3263_v10 }
 0xbf1   : > { %2882 = vmatmul.mubr.msk.f32.vlgmr.msra.gmra.mrb[20].mxu1 %vm416_vm4, %v3677_v24 }
 0xbf2   : > { %2891 = vmatprep.mubr.msk.f32.mxu1 %vm3262_vm1, %v3263_v10 }
 0xc51   : > { %v1578_v29 = vpop.f32.mrb[16].mxu1 }
 0xc52   : > { %v1810_v30 = vmul.f32 0.35355338, %v1578_v29  ;;  %v2868_v31 = vpop.f32.mrb[17].mxu1 }
 0xc54   : > { %v1814_v32 = vsel %vm416_vm4, %v1810_v30, -inf }
 0xc55   : > { %1815 = vmax.xlane.f32.xlu0 %v1814_v32 }
 0xcc0   : > { %v1654_v33 = vpop.f32.mrb[18].mxu1  ;;  %v1730_v34 = vpop.f32.mrb[10].mxu0 }
 0xcc1   : > { %v1811_v35 = vmul.f32 0.35355338, %v1654_v33  ;;  %v1812_v36 = vmul.f32 0.35355338, %v1730_v34  ;;  %v2873_v37 = vpop.f32.mrb[19].mxu1  ;;  %v2878_v38 = vpop.f32.mrb[11].mxu0 }
 0xcc3   : > { %v1820_v39 = vsel %vm416_vm4, %v1812_v36, -inf  ;;  %v1817_v40 = vsel %vm416_vm4, %v1811_v35, -inf }
 0xcc4   : > { %1821 = vmax.xlane.f32.xlu0 %v1820_v39  ;;  %1818 = vmax.xlane.f32.xlu1 %v1817_v40  ;;  %v1806_v41 = vpop.f32.mrb[20].mxu1  ;;  %v2656_v40 = vld [vmem:[#allocation5 + $0x9] ss:$0 sm:$0xff] }
 0xcc5   : > { %v1813_v42 = vmul.f32 0.35355338, %v1806_v41  ;;  %v2883_v43 = vpop.f32.mrb[21].mxu1 }
 0xcc7   : > { %v1823_v44 = vsel %vm416_vm4, %v1813_v42, -inf }
 0xcc8   : > { %1824 = vmax.xlane.f32.xlu0 %v1823_v44 }
 0xcd5   : > { %1858 = vrot.lane.b32.xlu1 %v1496_v20, %s3268_s17  ;;  %v2651_v20 = vld [vmem:[%s3865_s2 + $0x20] sm:$0xff] }
 0xce2   : > { %v1816_v45 = vpop.xlane.xlu0 %1815 }
 0xce3   : > { %v1826_v46 = vsub.f32 %v1810_v30, %v1816_v45 }
 0xce5   : > { %v1830_v47 = vmul.f32 1.442695, %v1826_v46 }
 0xce7   : > { %3103 = vpow2.f32 %v1830_v47 }
 0xcf1   : > { %v3104_v48 = vpop.eup %3103 }
 0xcf2   : > { %v1838_v50 = vsel %vm416_vm4, %v3104_v48, 0.0 }
 0xcf9   : > { %1839 = vadd.xlane.f32.xlu1 %v1838_v50 }
 0xd51   : > { %v1822_v51 = vpop.xlane.xlu0 %1821  ;;  %v1819_v52 = vpop.xlane.xlu1 %1818 }
 0xd52   : > { %v1828_v53 = vsub.f32 %v1812_v36, %v1822_v51  ;;  %v1827_v54 = vsub.f32 %v1811_v35, %v1819_v52  ;;  %v2662_v51 = vld [vmem:[%s3866_s3 + $0x38] sm:$0xff] }
 0xd54   : > { %v1834_v55 = vmul.f32 1.442695, %v1828_v53  ;;  %v1832_v56 = vmul.f32 1.442695, %v1827_v54  ;;  %v2665_v53 = vld [vmem:[%s3867_s4 + $0x40] sm:$0xff]  ;;  %v2666_v54 = vld [vmem:[%s3867_s4 + $0x48] sm:$0xff] }
 0xd55   : > { %v1859_v57 = vpop.permute.xlu1 %1858  ;;  %v1825_v58 = vpop.xlane.xlu0 %1824 }
 0xd56   : > { %3105 = vpow2.f32 %v1834_v55  ;;  %v1829_v59 = vsub.f32 %v1813_v42, %v1825_v58  ;;  %2885 = vmatpush3.msra.mxu0 %v1859_v57  ;;  %v2667_v55 = vld [vmem:[%s3867_s4 + $0x50] sm:$0xff]  ;;  %v2668_v57 = vld [vmem:[%s3867_s4 + $0x58] sm:$0xff] }
 0xd57   : > { %3107 = vpow2.f32 %v1832_v56  ;;  %2894 = vmatprep.subr.mxu0 %v3263_v10  ;;  %v2994_v56 = vpack.c.bf16 %v2666_v54, %v2665_v53  ;;  %v2997_v58 = vpack.c.bf16 %v2668_v57, %v2667_v55  ;;  %v2676_v53 = vld [vmem:[#allocation5 + $0x11] ss:$0 sm:$0xff] }
 0xd58   : > { %v1836_v60 = vmul.f32 1.442695, %v1829_v59  ;;  %v2669_v59 = vld [vmem:[%s3867_s4 + $0x60] sm:$0xff] }
 0xd5a   : > { %3109 = vpow2.f32 %v1836_v60  ;;  %v2670_v60 = vld [vmem:[%s3867_s4 + $0x68] sm:$0xff] }
 0xd60   : > { %v3106_v61 = vpop.eup %3105 }
 0xd61   : > { %v3108_v62 = vpop.eup %3107  ;;  %v1844_v63 = vsel %vm416_vm4, %v3106_v61, 0.0 }
 0xd62   : > { %1845 = vadd.xlane.f32.xlu1 %v1844_v63  ;;  %v1841_v0 = vsel %vm416_vm4, %v3108_v62, 0.0 }
 0xd63   : > { %1842 = vadd.xlane.f32.xlu0 %v1841_v0 }
 0xd64   : > { %v3110_v1 = vpop.eup %3109 }
 0xd65   : > { %v1847_v2 = vsel %vm416_vm4, %v3110_v1, 0.0 }
 0xd67   : > { %1848 = vadd.xlane.f32.xlu0 %v1847_v2 }
 0xd73   : > { %2010 = vrot.lane.b32.xlu1 %v3669_v22, %s3268_s17  ;;  %v2982_v22 = vpack.c.bf16 %v2652_v21, %v2651_v20  ;;  %v2671_v20 = vld [vmem:[%s3867_s4 + $0x70] sm:$0xff]  ;;  %v2672_v21 = vld [vmem:[%s3867_s4 + $0x78] sm:$0xff] }
 0xd77   : > { %2086 = vrot.lane.b32.xlu1 %v3677_v24, %s3268_s17 }
 0xd7d   : > { %1934 = vrot.lane.b32.xlu0 %v3671_v23, %s3268_s17 }
 0xd86   : > { %v1840_v3 = vpop.xlane.xlu1 %1839 }
 0xd87   : > { %3111 = vrcp.f32 %v1840_v3 }
 0xd91   : > { %v3112_v4 = vpop.eup %3111 }
 0xd92   : > { %v1854_v5 = vmul.f32 %v3112_v4, %v3104_v48  ;;  %v2661_v48 = vld [vmem:[%s3866_s3 + $0x30] sm:$0xff] }
 0xd93   : > { %v2991_v52 = vpack.c.bf16 %v2662_v51, %v2661_v48 }
 0xd94   : > { %2887 = vmatmul.mubr.msk.f32.vlgmr.msra.gmra.mrb[12].mxu0 %vm416_vm4, %v1854_v5 }
 0xd95   : > { %2896 = vmatprep.mubr.msk.f32.mxu0 %vm3262_vm1, %v3263_v10 }
 0xdef   : > { %v1846_v6 = vpop.xlane.xlu1 %1845 }
 0xdf0   : > { %3113 = vrcp.f32 %v1846_v6  ;;  %v1843_v8 = vpop.xlane.xlu0 %1842 }
 0xdf1   : > { %3115 = vrcp.f32 %v1843_v8 }
 0xdf3   : > { %v2011_v9 = vpop.permute.xlu1 %2010 }
 0xdf4   : > { %v1849_v11 = vpop.xlane.xlu0 %1848  ;;  %2895 = vmatpush3.msra.mxu0 %v2011_v9 }
 0xdf5   : > { %3117 = vrcp.f32 %v1849_v11  ;;  %2981 = vmatprep.subr.bf16.mxu0 %v3261_v7 }
 0xdf7   : > { %v2087_v17 = vpop.permute.xlu1 %2086 }
 0xdf8   : > { %v1935_v12 = vpop.permute.xlu0 %1934 }
 0xdf9   : > { %2890 = vmatpush3.msra.mxu1 %v1935_v12 }
 0xdfa   : > { %v3114_v13 = vpop.eup %3113  ;;  %2899 = vmatprep.subr.mxu1 %v3263_v10 }
 0xdfb   : > { %v3116_v14 = vpop.eup %3115  ;;  %v1856_v15 = vmul.f32 %v3114_v13, %v3106_v61  ;;  %v3000_v61 = vpack.c.bf16 %v2670_v60, %v2669_v59 }
 0xdfc   : > { %v1855_v16 = vmul.f32 %v3116_v14, %v3108_v62  ;;  %v2657_v14 = vld [vmem:[#allocation5 + $0xe] ss:$0 sm:$0xff] }
 0xdfd   : > { %2897 = vmatmul.mubr.msk.f32.vlgmr.msra.gmra.mrb[14].mxu0 %vm416_vm4, %v1856_v15 }
 0xdfe   : > { %2892 = vmatmul.mubr.msk.f32.vlgmr.msra.gmra.mrb[22].mxu1 %vm416_vm4, %v1855_v16  ;;  %2912 = vmatprep.mubr.msk.f32.mxu0 %vm3262_vm1, %v3263_v10 }
 0xdff   : > { %v3118_v18 = vpop.eup %3117  ;;  %2900 = vmatpush3.msra.mxu1 %v2087_v17  ;;  %2901 = vmatprep.mubr.msk.f32.mxu1 %vm3262_vm1, %v3263_v10  ;;  %v2658_v17 = vld [vmem:[#allocation5 + $0xf] ss:$0 sm:$0xff] }
 0xe00   : > { %v1857_v19 = vmul.f32 %v3118_v18, %v3110_v1  ;;  %2987 = vmatprep.subr.bf16.mxu1 %v3261_v7  ;;  %2983 = vmatpush3.bf16.msra.mxu0 %v2982_v22  ;;  %v3003_v22 = vpack.c.bf16 %v2672_v21, %v2671_v20 }
 0xe01   : > { %2984 = vmatprep.subr.bf16.mxu0 %v3261_v7 }
 0xe02   : > { %2902 = vmatmul.mubr.msk.f32.vlgmr.msra.gmra.mrb[24].mxu1 %vm416_vm4, %v1857_v19 }
 0xe03   : > { %2923 = vmatprep.mubr.msk.f32.mxu1 %vm3262_vm1, %v3263_v10 }
 0xe04   : > { %2986 = vmatpush3.bf16.msra.mxu0 %v2985_v27 }
 0xe05   : > { %2993 = vmatprep.subr.bf16.mxu0 %v3261_v7 }
 0xe67   : > { %v1930_v23 = vpop.f32.mrb[12].mxu0 }
 0xe68   : > { %v2888_v24 = vpop.f32.mrb[13].mxu0 }
 0xed0   : > { %v2082_v28 = vpop.f32.mrb[14].mxu0 }
 0xed1   : > { %v2006_v29 = vpop.f32.mrb[22].mxu1  ;;  %2167 = vrot.lane.b32.xlu1 %v2082_v28, %s3888_s10  ;;  %v2898_v30 = vpop.f32.mrb[15].mxu0  ;;  %v2674_v28 = vld [vmem:[#allocation5 + $0xb] ss:$0 sm:$0xff]  ;;  %s3891_s10 = sshll.u32 %s3444_s26, 3 }
 0xed2   : > { %2163 = vrot.lane.b32.xlu0 %v2006_v29, %s3889_s11  ;;  %v2893_v31 = vpop.f32.mrb[23].mxu1  ;;  %s281_s11 = scalar_lea.vmem [#allocation7], %s3891_s10 }
 0xed5   : > { %v2158_v32 = vpop.f32.mrb[24].mxu1 }
 0xed6   : > { %2171 = vrot.lane.b32.xlu0 %v2158_v32, %s3890_s20  ;;  %v2903_v33 = vpop.f32.mrb[25].mxu1  ;;  %s2517_s20 = sshll.u32 %s281_s11, 4  ;;  %s3820_s20 = int_to_ptr.vmem [resolvable:$true] %s2517_s20 }
 0xed7   : > { %s3185_s7 = scalar_lea.vmem %s3820_s20, 128  ;;  %p3192_p10 = scmp.lt.s32.totalorder %s3820_s20, %s3190_s30 }
 0xed8   : > { %p3186_p4 = scmp.ne.s32.totalorder %s3820_s20, %s3185_s7  ;;  %p3193_p13 = scmp.lt.s32.totalorder %s3191_s16, %s3185_s7 }
 0xeda   : > { %p3187_p6 = pnand %p3186_p4, %p3399_p12  ;;  %p3194_p3 = por %p3193_p13, %p3192_p10 }
 0xedc   : > { %p3188_p8 = pneg %p3187_p6 }
 0xede   : > { %p3195_p7 = pnand %p3194_p3, %p3188_p8 }
 0xf43   : > { %v2168_v35 = vpop.permute.xlu1 %2167 }
 0xf44   : > { %v2164_v34 = vpop.permute.xlu0 %2163 }
 0xf45   : > { %v2174_v36 = vsel %vm416_vm4, %v1930_v23, %v2164_v34  ;;  %v2663_v23 = vld [vmem:[#allocation5 + $0xa] ss:$0 sm:$0xff] }
 0xf46   : > { %v2175_v37 = vsel %vm1084_vm5, %v2174_v36, %v2168_v35 }
 0xf48   : > { %v2172_v38 = vpop.permute.xlu0 %2171 }
 0xf49   : > { %v2176_v39 = vsel %vm1086_vm6, %v2175_v37, %v2172_v38 }
 0xf4a   : > { %2913 = vmatmul.mubr.msk.f32.vlgmr.msra.gmra.mrb[16].mxu0 %vm291_vm0, %v2176_v39 }
 0xf4b   : > { %2942 = vmatprep.mubr.msk.f32.mxu0 %vm3262_vm1, %v3263_v10  ;;  %v2659_v10 = vld [vmem:[%s3866_s3 + $0x20] sm:$0xff]  ;;  %2995 = vmatpush3.bf16.msra.mxu0 %v2994_v56 }
 0xf4c   : > { %2996 = vmatprep.subr.bf16.mxu0 %v3261_v7 }
 0xf4f   : > { %2998 = vmatpush3.bf16.msra.mxu0 %v2997_v58 }
 0xf50   : > { %2999 = vmatprep.subr.bf16.mxu0 %v3261_v7 }
 0xf53   : > { %3001 = vmatpush3.bf16.msra.mxu0 %v3000_v61 }
 0xf54   : > { %3002 = vmatprep.subr.bf16.mxu0 %v3261_v7 }
 0xf57   : > { %3004 = vmatpush3.bf16.msra.mxu0 %v3003_v22 }
0x101d   : > { %v2251_v41 = vpop.f32.mrb[16].mxu0 }
0x101e   : > { %v2255_v42 = vadd.f32 %v2251_v41, %v3640_v49  ;;  %v2914_v43 = vpop.f32.mrb[17].mxu0  ;;  %v2660_v49 = vld [vmem:[%s3866_s3 + $0x28] sm:$0xff] }
0x101f   : > { %v2988_v50 = vpack.c.bf16 %v2660_v49, %v2659_v10 }
0x1020   : > { %v3759_v44 = vadd.f32 %v2656_v40, %v2255_v42 }
0x1021   : > { %2989 = vmatpush3.bf16.msra.mxu1 %v2988_v50  ;;  %v2675_v50 = vld [vmem:[#allocation5 + $0x10] ss:$0 sm:$0xff] }
0x1022   : > { %v2261_v45 = vsel %vm291_vm0, %v3759_v44, 0.0  ;;  %v2264_v46 = vmul.f32 %v3759_v44, %v3759_v44  ;;  %2990 = vmatprep.subr.bf16.mxu1 %v3261_v7 }
0x1023   : > { %2262 = vadd.xlane.f32.xlu1 %v2261_v45 }
0x1024   : > { %v2265_v47 = vsel %vm291_vm0, %v2264_v46, 0.0 }
0x1025   : > { %2266 = vadd.xlane.f32.xlu0 %v2265_v47  ;;  %2992 = vmatpush3.bf16.msra.mxu1 %v2991_v52 }
0x10b0   : > { %v2263_v62 = vpop.xlane.xlu1 %2262 }
0x10b1   : > { %v2268_v63 = vmul.f32 0.03125, %v2263_v62 }
0x10b2   : > { %v2267_v2 = vpop.xlane.xlu0 %2266 }
0x10b3   : > { %v2269_v0 = vmul.f32 32.0, %v2268_v63  ;;  %v2281_v7 = vsub.f32 %v3759_v44, %v2268_v63 }
0x10b5   : > { %v2270_v1 = vmul.f32 %v2269_v0, %v2268_v63  ;;  %v2286_v15 = vmul.f32 %v2657_v14, %v2281_v7 }
0x10b7   : > { %v2271_v3 = vsub.f32 %v2267_v2, %v2270_v1 }
0x10b9   : > { %v2272_v4 = vmul.f32 0.032258064, %v2271_v3 }
0x10bb   : > { %v2273_v5 = vmax.f32 %v2272_v4, 0.0 }
0x10bd   : > { %3119 = vrsqrt.f32 %v2273_v5  ;;  %vm2276_vm12 = vcmp.eq.f32.partialorder %v2273_v5, inf  ;;  %v2279_v9 = vand.u32 2147483648, %v2273_v5  ;;  %vm2278_vm13 = vcmp.eq.f32.partialorder %v2273_v5, 0.0 }
0x10c7   : > { %v3120_v6 = vpop.eup %3119 }
0x10c8   : > { %v2275_v8 = vmul.f32 %v3120_v6, %v2273_v5 }
0x10ca   : > { %v2277_v11 = vsel %vm2276_vm12, %v2273_v5, %v2275_v8 }
0x10cb   : > { %v2280_v12 = vsel %vm2278_vm13, %v2279_v9, %v2277_v11 }
0x10cc   : > { %v2287_v13 = vadd.f32 1e-06, %v2280_v12 }
0x10ce   : > { %3121 = vrcp.f32 %v2287_v13 }
0x10d8   : > { %v3122_v16 = vpop.eup %3121 }
0x10d9   : > { %v2289_v18 = vmul.f32 %v3122_v16, %v2286_v15 }
0x10db   : > { %v2294_v19 = vadd.f32 %v2658_v17, %v2289_v18 }
0x10dd   : > { %2924 = vmatmul.mubr.msk.f32.vlgmr.msra.gmra.mrb[26].mxu1 %vm291_vm0, %v2294_v19 }
0x11b0   : > { %v2373_v24 = vpop.f32.mrb[26].mxu1 }
0x11b1   : > { %v2374_v25 = vadd.f32 %v2663_v23, %v2373_v24  ;;  %v2925_v26 = vpop.f32.mrb[27].mxu1 }
0x11b3   : > { %v2377_v27 = vmax.f32 %v2374_v25, 0.0 }
0x11b5   : > { %2943 = vmatmul.mubr.msk.f32.vlgmr.msra.gmra.mrb[18].mxu0 %vm1295_vm9, %v2377_v27 }
0x1288   : > { %v2456_v29 = vpop.f32.mrb[18].mxu0 }
0x1289   : > { %v2460_v30 = vadd.f32 %v2456_v29, %v3759_v44  ;;  %v2944_v31 = vpop.f32.mrb[19].mxu0 }
0x128b   : > { %v2465_v32 = vadd.f32 %v2674_v28, %v2460_v30 }
0x128d   : > { %v2468_v33 = vsel %vm291_vm0, %v2465_v32, 0.0  ;;  %v2471_v34 = vmul.f32 %v2465_v32, %v2465_v32 }
0x128e   : > { %2469 = vadd.xlane.f32.xlu0 %v2468_v33 }
0x128f   : > { %v2472_v35 = vsel %vm291_vm0, %v2471_v34, 0.0 }
0x1290   : > { %2473 = vadd.xlane.f32.xlu1 %v2472_v35 }
0x131b   : > { %v2470_v36 = vpop.xlane.xlu0 %2469 }
0x131c   : > { %v2475_v37 = vmul.f32 0.03125, %v2470_v36 }
0x131d   : > { %v2474_v40 = vpop.xlane.xlu1 %2473 }
0x131e   : > { %v2476_v38 = vmul.f32 32.0, %v2475_v37  ;;  %v2488_v48 = vsub.f32 %v2465_v32, %v2475_v37 }
0x1320   : > { %v2477_v39 = vmul.f32 %v2476_v38, %v2475_v37  ;;  %v2493_v51 = vmul.f32 %v2675_v50, %v2488_v48 }
0x1322   : > { %v2478_v41 = vsub.f32 %v2474_v40, %v2477_v39 }
0x1324   : > { %v2479_v42 = vmul.f32 0.032258064, %v2478_v41 }
0x1326   : > { %v2480_v43 = vmax.f32 %v2479_v42, 0.0 }
0x1328   : > { %3123 = vrsqrt.f32 %v2480_v43  ;;  %vm2483_vm14 = vcmp.eq.f32.partialorder %v2480_v43, inf  ;;  %v2486_v46 = vand.u32 2147483648, %v2480_v43  ;;  %vm2485_vm15 = vcmp.eq.f32.partialorder %v2480_v43, 0.0 }
0x1332   : > { %v3124_v44 = vpop.eup %3123 }
0x1333   : > { %v2482_v45 = vmul.f32 %v3124_v44, %v2480_v43 }
0x1335   : > { %v2484_v47 = vsel %vm2483_vm14, %v2480_v43, %v2482_v45 }
0x1336   : > { %v2487_v10 = vsel %vm2485_vm15, %v2486_v46, %v2484_v47 }
0x1337   : > { %v2494_v49 = vadd.f32 1e-06, %v2487_v10 }
0x1339   : > { %3125 = vrcp.f32 %v2494_v49 }
0x1343   : > { %v3126_v52 = vpop.eup %3125 }
0x1344   : > { %v2496_v54 = vmul.f32 %v3126_v52, %v2493_v51 }
0x1346   : > { %v2501_v55 = vadd.f32 %v2676_v53, %v2496_v54 }
0x1348   : > { %2502 = vst.msk [vmem:[%s281_s11] sm:$0xff] %vm291_vm0, %v2501_v55 }
0x1349   : > { %3198 = shalt.err (!%p3195_p7)
}
0x134a   : > { %s3199_s26 = scalar_lea.hbm %s3818_s12, 128  ;;  %s3203_s27 = scalar_lea.hbm %s3869_s6, 256 }
0x134b   : > { %p3200_p9 = scmp.ne.s32.totalorder %s3818_s12, %s3199_s26  ;;  %p3204_p0 = scmp.lt.u32.totalorder %s3818_s12, %s3869_s6 }
0x134c   : > { %p3205_p11 = scmp.lt.u32.totalorder %s3203_s27, %s3199_s26  ;;  %p3207_p4 = scmp.lt.u32.totalorder %s3199_s26, %s3818_s12 }
0x134d   : > { %p3201_p2 = pnand %p3200_p9, %p3399_p12 }
0x134e   : > { %p3206_p1 = por %p3205_p11, %p3204_p0 }
0x134f   : > { %p3202_p5 = pneg %p3201_p2 }
0x1350   : > { %p3208_p6 = por %p3207_p4, %p3206_p1 }
0x1352   : > { %p3209_p8 = pnand %p3208_p6, %p3202_p5 }
0x1354   : > { %3212 = shalt.err (!%p3209_p8)
}
0x1355   : > { %3011 = dma.vmem_to_hbm [thread:$0]  (%p3399_p12), %s3820_s20, 128, %s3818_s12, %s2504_s18  }
0x1356 PF: > { %s2529_s11 = sand.u32 1, %s3243_s21   ;;  %p3892_p10 = scmp.ne.s32.totalorder %s3878_s28, 0 }
0x1357   : > { %p3893_p13 = scmp.ge.s32.totalorder %s3255_s24, 2  ;;  %s2530_s29 = scalar_lea.sflag [#allocation4], %s2529_s11 }
0x1359   : > { %p3022_p3 = pnand %p3893_p13, %p3892_p10 }
0x135b   : > { %3238 = dma.done.wait (!%p3022_p3), %s2530_s29, 128  }
0x135c   : > { %3240 = vsyncadd (!%p3022_p3), %s2530_s29, 4294967168  ;;  %p20_p7 = scmp.ge.s32.totalorder %s3364_s9, 4   ;;  %s3894_s21 = smov %s3247_s22 }
0x135d   : > { %s3895_s22 = smov %s3251_s23  ;;  %s3896_s23 = smov %s3395_s13 }
0x135e   : > { %s3897_s24 = smov %s3364_s9  ;;  %22 = sbr.rel (!%p20_p7) target bundleno = 6 (0x6), region = 97 }
0x1365   :  { %2535 = vsyncpa [#allocation3], 1 }
0x1366   :  { %2537 = vsyncpa [#allocation3 + $0x1], 1 }
0x1367   :  { %2538 = vsyncpa [#allocation6], 1 }
0x1368   :  { %2539 = vsyncpa [#allocation4], 1 }
0x1369   :  { %2541 = vsyncpa [#allocation4 + $0x1], 1 }

</bundles_post_ra>
